<compile_context>
chip_gen: v6e
topology: v6e:2x2x1
jax: 0.10.0
libtpu: 0.0.40
codegen_flags: <defaults>
</compile_context>

<pallas_src>
import functools
import math

import jax
import jax.numpy as jnp
from jax import lax
from jax.experimental import pallas as pl
from jax.experimental.pallas import tpu as pltpu


# ----------------------------------------------------------------------------
# Fused kernel: prediction FMA + agreement routing, one batch sample per step.
# ----------------------------------------------------------------------------
def _caps_layer_kernel(caps_ref, wt_ref, b_ref, out_ref, u_ref, *,
                       input_dim, output_caps, output_dim, n_iterations):
    f32 = jnp.float32
    IC, N = u_ref.shape                 # N = output_caps * output_dim
    OC, OD = output_caps, output_dim

    # ---- u_predict[i, n] = sum_d caps[i, d] * W[i, d, n]  (VPU FMA over d) --
    caps = caps_ref[...].astype(f32)                    # (IC, ID)
    u = caps[:, 0:1] * wt_ref[0]                        # (IC, 1) * (IC, N)
    for d in range(1, input_dim):
        u = u + caps[:, d:d + 1] * wt_ref[d]
    u_ref[...] = u                                      # stays in VMEM (fused)

    # ---- block-diagonal "expand over output_dim" matrices (hoisted) ---------
    # e_mat[oc, n]  = 1 iff lane n belongs to output capsule oc   (OC, N)
    # e_mat_t[n,oc] = transpose, used for per-capsule reductions  (N, OC)
    n_idx = lax.broadcasted_iota(jnp.int32, (OC, N), 1)
    oc_idx = lax.broadcasted_iota(jnp.int32, (OC, N), 0)
    e_mat = ((n_idx >= oc_idx * OD) & (n_idx < (oc_idx + 1) * OD)).astype(f32)
    n_idx_t = lax.broadcasted_iota(jnp.int32, (N, OC), 0)
    oc_idx_t = lax.broadcasted_iota(jnp.int32, (N, OC), 1)
    e_mat_t = ((n_idx_t >= oc_idx_t * OD)
               & (n_idx_t < (oc_idx_t + 1) * OD)).astype(f32)

    def softmax_over_oc(logits):                        # (.., OC), stable
        m = jnp.max(logits, axis=-1, keepdims=True)
        e = jnp.exp(logits - m)
        denom = jnp.sum(e, axis=-1, keepdims=True)
        return e * pl.reciprocal(denom, approx=True)    # EUP, not VPU divide

    def squash_flat(s):                                 # s: (1, N) = flat (OC, OD)
        lengths2 = jnp.dot(s * s, e_mat_t, preferred_element_type=f32)  # (1, OC)
        scale = (lengths2
                 * pl.reciprocal(1.0 + lengths2, approx=True)
                 * lax.rsqrt(lengths2 + 1e-12))         # eps: no NaN at ||s||=0
        return s * jnp.dot(scale, e_mat, preferred_element_type=f32)    # (1, N)

    # ---- routing, initial pass (shared logits b) ----------------------------
    b0 = b_ref[...]                                     # (IC, OC)
    c_exp = jnp.dot(softmax_over_oc(b0), e_mat, preferred_element_type=f32)
    u_all = u_ref[...]
    s = jnp.sum(c_exp * u_all, axis=0, keepdims=True)   # (1, N)
    v = squash_flat(s)

    # ---- agreement routing iterations (statically unrolled) -----------------
    b_s = b0
    for _ in range(n_iterations):
        u_all = u_ref[...]
        # b[i, oc] += sum_od u[i, oc, od] * v[oc, od]   -> MXU, K = OC*OD
        b_s = b_s + jnp.dot(u_all * v, e_mat_t, preferred_element_type=f32)
        c_exp = jnp.dot(softmax_over_oc(b_s), e_mat, preferred_element_type=f32)
        s = jnp.sum(c_exp * u_all, axis=0, keepdims=True)
        v = squash_flat(s)

    out_ref[...] = v.astype(out_ref.dtype)              # (1, N) lane-dense store


def caps_layer_forward(caps_output, weights, b_logits, *,
                       output_caps, output_dim, n_iterations):
    B, IC, ID = caps_output.shape
    N = output_caps * output_dim
    assert weights.shape == (IC, ID, N)
    assert b_logits.shape == (IC, output_caps)

    # Pre-transpose weights to (ID, IC, N): each unrolled FMA step then reads a
    # contiguous lane-dense (IC, N) slab via a leading-dim ref index.
    w_t = jnp.transpose(weights, (1, 0, 2))

    kernel = functools.partial(
        _caps_layer_kernel,
        input_dim=ID, output_caps=output_caps, output_dim=output_dim,
        n_iterations=n_iterations)

    v_flat = pl.pallas_call(
        kernel,
        out_shape=jax.ShapeDtypeStruct((B, 1, N), caps_output.dtype),
        grid=(B,),
        in_specs=[
            # per-sample capsule activations (streamed over the batch grid)
            pl.BlockSpec((None, IC, ID), lambda i: (i, 0, 0)),
            # weights + routing logits: same block every step -> DMA'd once,
            # resident in VMEM across the whole grid
            pl.BlockSpec((ID, IC, N), lambda i: (0, 0, 0)),
            pl.BlockSpec((IC, output_caps), lambda i: (0, 0)),
        ],
        out_specs=pl.BlockSpec((None, 1, N), lambda i: (i, 0, 0)),
        scratch_shapes=[pltpu.VMEM((IC, N), jnp.float32)],  # fused u_predict
        compiler_params=pltpu.CompilerParams(
            # batch axis is embarrassingly parallel (multi-TC sharding);
            # per-sample work amortizes the per-step grid overhead.
            dimension_semantics=("parallel",)),
    )(caps_output, w_t, b_logits)

    return v_flat.reshape(B, output_caps, output_dim)


# ----------------------------------------------------------------------------
# Module-like wrappers (parameter holders; forward is the fused kernel above)
# ----------------------------------------------------------------------------
class AgreementRouting:
    """Holds the trainable routing logits `b` and the iteration count.

    The routing computation itself is fused into the CapsLayer kernel so the
    u_predict tensor never round-trips through HBM.
    """

    def __init__(self, input_caps, output_caps, n_iterations):
        self.input_caps = input_caps
        self.output_caps = output_caps
        self.n_iterations = n_iterations
        # Equivalent of nn.Parameter(torch.zeros(...)): a parameter array that
        # is passed into the kernel on every call (update it to train).
        self.b = jnp.zeros((input_caps, output_caps), jnp.float32)


class CapsLayer:
    def __init__(self, input_caps, input_dim, output_caps, output_dim,
                 routing_module, key):
        self.input_caps = input_caps
        self.input_dim = input_dim
        self.output_caps = output_caps
        self.output_dim = output_dim
        self.routing_module = routing_module
        stdv = 1.0 / math.sqrt(input_caps)
        # weights ~ U(-stdv, stdv), PyTorch layout (IC, ID, OC*OD)
        self.weights = jax.random.uniform(
            key, (input_caps, input_dim, output_caps * output_dim),
            dtype=jnp.float32, minval=-stdv, maxval=stdv)

    def __call__(self, caps_output):
        return caps_layer_forward(
            caps_output, self.weights, self.routing_module.b,
            output_caps=self.output_caps, output_dim=self.output_dim,
            n_iterations=self.routing_module.n_iterations)


# ----------------------------------------------------------------------------
# Pure-JAX reference (mirrors the PyTorch forward) for validation.
# ----------------------------------------------------------------------------
def _caps_layer_reference(caps_output, weights, b_logits, output_caps,
                          output_dim, n_iterations):
    B, IC, ID = caps_output.shape
    u = jnp.einsum('bid,idn->bin', caps_output, weights)
    u = u.reshape(B, IC, output_caps, output_dim)

    def squash(s):
        lengths2 = jnp.sum(s * s, axis=2)
        lengths = jnp.sqrt(lengths2)
        scale = lengths2 / (1.0 + lengths2) / lengths
        return s * scale[:, :, None]

    c = jax.nn.softmax(b_logits, axis=1)
    s = jnp.sum(c[None, :, :, None] * u, axis=1)
    v = squash(s)
    if n_iterations > 0:
        b_batch = jnp.broadcast_to(b_logits[None], (B, IC, output_caps))
        for _ in range(n_iterations):
            b_batch = b_batch + jnp.sum(u * v[:, None, :, :], axis=-1)
            c = jax.nn.softmax(b_batch, axis=-1)
            s = jnp.sum(c[..., None] * u, axis=1)
            v = squash(s)
    return v


if __name__ == "__main__":
    # Small shapes consistent with CapsNet's capsule stack:
    #   cap1-like:      input_caps=32, input_dim=8,  output_caps=8,  output_dim=16
    #   digitCaps-like: input_caps=8,  input_dim=16, output_caps=10, output_dim=16
    B = 2
    n_routing_iterations = 3

    key = jax.random.PRNGKey(0)
    k_w1, k_w2, k_x = jax.random.split(key, 3)

    routing1 = AgreementRouting(32, 8, n_routing_iterations)
    cap1 = CapsLayer(32, 8, 8, 16, routing1, k_w1)
    routing2 = AgreementRouting(8, 10, n_routing_iterations)
    digit_caps = CapsLayer(8, 16, 10, 16, routing2, k_w2)

    # TODO(synk): conv1 + PrimaryCapsLayer conv stem are plain convolutions and
    # are left to XLA; we start from (B, input_caps, input_dim) primary-capsule
    # activations directly.
    caps_output = jax.random.normal(k_x, (B, 32, 8), dtype=jnp.float32)

    v1 = cap1(caps_output)
    v2 = digit_caps(v1)
    probs = jnp.sqrt(jnp.sum(v2 * v2, axis=2))     # CapsNet class probabilities
    v2, probs = jax.block_until_ready((v2, probs))

    assert v1.shape == (B, 8, 16)
    assert v2.shape == (B, 10, 16)
    assert probs.shape == (B, 10)
    assert bool(jnp.all(jnp.isfinite(v2))) and bool(jnp.all(jnp.isfinite(probs)))

    # Cross-check the fused kernels against the pure-JAX reference forward.
    v1_ref = _caps_layer_reference(caps_output, cap1.weights, routing1.b,
                                   8, 16, n_routing_iterations)
    v2_ref = _caps_layer_reference(v1_ref, digit_caps.weights, routing2.b,
                                   10, 16, n_routing_iterations)
    err = float(jnp.max(jnp.abs(v2 - v2_ref)))
    assert err < 2e-2, f"mismatch vs reference: max abs err {err}"

    print("KERNEL_OK")
</pallas_src>

<mosaic_0001>
module attributes {stable_mosaic.version = 11 : i64} {
  func.func @_caps_layer_kernel(%arg0: i32, %arg1: memref<1x32x8xf32, #tpu.memory_space<vmem>>, %arg2: memref<8x32x128xf32, #tpu.memory_space<vmem>>, %arg3: memref<32x8xf32, #tpu.memory_space<vmem>>, %arg4: memref<1x1x128xf32, #tpu.memory_space<vmem>>, %arg5: memref<32x128xf32, #tpu.memory_space<vmem>>) attributes {dimension_semantics = [#tpu.dimension_semantics<parallel>], iteration_bounds = array<i64: 2>, scalar_prefetch = 0 : i64, scratch_operands = 1 : i64, tpu.core_type = #tpu.core_type<tc>, window_params = [{transform_indices = @transform_0, window_bounds = array<i64: 1, 32, 8>}, {pipeline_mode = #tpu.pipeline_mode<synchronous>, transform_indices = @transform_1, window_bounds = array<i64: 8, 32, 128>}, {pipeline_mode = #tpu.pipeline_mode<synchronous>, transform_indices = @transform_2, window_bounds = array<i64: 32, 8>}, {transform_indices = @transform_3, window_bounds = array<i64: 1, 1, 128>}]} {
    %c0 = arith.constant 0 : index
    %c0_0 = arith.constant 0 : index
    %c0_1 = arith.constant 0 : index
    %0 = vector.load %arg1[%c0, %c0_0, %c0_1] : memref<1x32x8xf32, #tpu.memory_space<vmem>>, vector<1x32x8xf32>
    %1 = vector.shape_cast %0 : vector<1x32x8xf32> to vector<32x8xf32>
    %2 = vector.extract_strided_slice %1 {offsets = [0, 0], sizes = [32, 1], strides = [1, 1]} : vector<32x8xf32> to vector<32x1xf32>
    %c0_2 = arith.constant 0 : index
    %c0_3 = arith.constant 0 : index
    %c0_4 = arith.constant 0 : index
    %3 = vector.load %arg2[%c0_2, %c0_3, %c0_4] : memref<8x32x128xf32, #tpu.memory_space<vmem>>, vector<1x32x128xf32>
    %4 = vector.shape_cast %3 : vector<1x32x128xf32> to vector<32x128xf32>
    %5 = vector.broadcast %2 : vector<32x1xf32> to vector<32x128xf32>
    %6 = arith.mulf %5, %4 : vector<32x128xf32>
    %7 = vector.extract_strided_slice %1 {offsets = [0, 1], sizes = [32, 1], strides = [1, 1]} : vector<32x8xf32> to vector<32x1xf32>
    %c1 = arith.constant 1 : index
    %c0_5 = arith.constant 0 : index
    %c0_6 = arith.constant 0 : index
    %8 = vector.load %arg2[%c1, %c0_5, %c0_6] : memref<8x32x128xf32, #tpu.memory_space<vmem>>, vector<1x32x128xf32>
    %9 = vector.shape_cast %8 : vector<1x32x128xf32> to vector<32x128xf32>
    %10 = vector.broadcast %7 : vector<32x1xf32> to vector<32x128xf32>
    %11 = arith.mulf %10, %9 : vector<32x128xf32>
    %12 = arith.addf %6, %11 : vector<32x128xf32>
    %13 = vector.extract_strided_slice %1 {offsets = [0, 2], sizes = [32, 1], strides = [1, 1]} : vector<32x8xf32> to vector<32x1xf32>
    %c2 = arith.constant 2 : index
    %c0_7 = arith.constant 0 : index
    %c0_8 = arith.constant 0 : index
    %14 = vector.load %arg2[%c2, %c0_7, %c0_8] : memref<8x32x128xf32, #tpu.memory_space<vmem>>, vector<1x32x128xf32>
    %15 = vector.shape_cast %14 : vector<1x32x128xf32> to vector<32x128xf32>
    %16 = vector.broadcast %13 : vector<32x1xf32> to vector<32x128xf32>
    %17 = arith.mulf %16, %15 : vector<32x128xf32>
    %18 = arith.addf %12, %17 : vector<32x128xf32>
    %19 = vector.extract_strided_slice %1 {offsets = [0, 3], sizes = [32, 1], strides = [1, 1]} : vector<32x8xf32> to vector<32x1xf32>
    %c3 = arith.constant 3 : index
    %c0_9 = arith.constant 0 : index
    %c0_10 = arith.constant 0 : index
    %20 = vector.load %arg2[%c3, %c0_9, %c0_10] : memref<8x32x128xf32, #tpu.memory_space<vmem>>, vector<1x32x128xf32>
    %21 = vector.shape_cast %20 : vector<1x32x128xf32> to vector<32x128xf32>
    %22 = vector.broadcast %19 : vector<32x1xf32> to vector<32x128xf32>
    %23 = arith.mulf %22, %21 : vector<32x128xf32>
    %24 = arith.addf %18, %23 : vector<32x128xf32>
    %25 = vector.extract_strided_slice %1 {offsets = [0, 4], sizes = [32, 1], strides = [1, 1]} : vector<32x8xf32> to vector<32x1xf32>
    %c4 = arith.constant 4 : index
    %c0_11 = arith.constant 0 : index
    %c0_12 = arith.constant 0 : index
    %26 = vector.load %arg2[%c4, %c0_11, %c0_12] : memref<8x32x128xf32, #tpu.memory_space<vmem>>, vector<1x32x128xf32>
    %27 = vector.shape_cast %26 : vector<1x32x128xf32> to vector<32x128xf32>
    %28 = vector.broadcast %25 : vector<32x1xf32> to vector<32x128xf32>
    %29 = arith.mulf %28, %27 : vector<32x128xf32>
    %30 = arith.addf %24, %29 : vector<32x128xf32>
    %31 = vector.extract_strided_slice %1 {offsets = [0, 5], sizes = [32, 1], strides = [1, 1]} : vector<32x8xf32> to vector<32x1xf32>
    %c5 = arith.constant 5 : index
    %c0_13 = arith.constant 0 : index
    %c0_14 = arith.constant 0 : index
    %32 = vector.load %arg2[%c5, %c0_13, %c0_14] : memref<8x32x128xf32, #tpu.memory_space<vmem>>, vector<1x32x128xf32>
    %33 = vector.shape_cast %32 : vector<1x32x128xf32> to vector<32x128xf32>
    %34 = vector.broadcast %31 : vector<32x1xf32> to vector<32x128xf32>
    %35 = arith.mulf %34, %33 : vector<32x128xf32>
    %36 = arith.addf %30, %35 : vector<32x128xf32>
    %37 = vector.extract_strided_slice %1 {offsets = [0, 6], sizes = [32, 1], strides = [1, 1]} : vector<32x8xf32> to vector<32x1xf32>
    %c6 = arith.constant 6 : index
    %c0_15 = arith.constant 0 : index
    %c0_16 = arith.constant 0 : index
    %38 = vector.load %arg2[%c6, %c0_15, %c0_16] : memref<8x32x128xf32, #tpu.memory_space<vmem>>, vector<1x32x128xf32>
    %39 = vector.shape_cast %38 : vector<1x32x128xf32> to vector<32x128xf32>
    %40 = vector.broadcast %37 : vector<32x1xf32> to vector<32x128xf32>
    %41 = arith.mulf %40, %39 : vector<32x128xf32>
    %42 = arith.addf %36, %41 : vector<32x128xf32>
    %43 = vector.extract_strided_slice %1 {offsets = [0, 7], sizes = [32, 1], strides = [1, 1]} : vector<32x8xf32> to vector<32x1xf32>
    %c7 = arith.constant 7 : index
    %c0_17 = arith.constant 0 : index
    %c0_18 = arith.constant 0 : index
    %44 = vector.load %arg2[%c7, %c0_17, %c0_18] : memref<8x32x128xf32, #tpu.memory_space<vmem>>, vector<1x32x128xf32>
    %45 = vector.shape_cast %44 : vector<1x32x128xf32> to vector<32x128xf32>
    %46 = vector.broadcast %43 : vector<32x1xf32> to vector<32x128xf32>
    %47 = arith.mulf %46, %45 : vector<32x128xf32>
    %48 = arith.addf %42, %47 : vector<32x128xf32>
    %c0_19 = arith.constant 0 : index
    %c0_20 = arith.constant 0 : index
    %49 = vector.load %arg5[%c0_19, %c0_20] : memref<32x128xf32, #tpu.memory_space<vmem>>, vector<32x128xf32>
    tpu.vector_store %arg5[%c0_19, %c0_20], %48 {strides = array<i32>} : memref<32x128xf32, #tpu.memory_space<vmem>>, vector<32x128xf32>,
    %50 = tpu.iota {dimensions = array<i32: 1>} : vector<8x128xi32>
    %51 = tpu.iota {dimensions = array<i32: 0>} : vector<8x128xi32>
    %c16_i32 = arith.constant 16 : i32
    %52 = vector.broadcast %c16_i32 : i32 to vector<8x128xi32>
    %53 = arith.muli %51, %52 : vector<8x128xi32>
    %54 = arith.cmpi sge, %50, %53 : vector<8x128xi32>
    %c1_i32 = arith.constant 1 : i32
    %55 = vector.broadcast %c1_i32 : i32 to vector<8x128xi32>
    %56 = arith.addi %51, %55 : vector<8x128xi32>
    %c16_i32_21 = arith.constant 16 : i32
    %57 = vector.broadcast %c16_i32_21 : i32 to vector<8x128xi32>
    %58 = arith.muli %56, %57 : vector<8x128xi32>
    %59 = arith.cmpi slt, %50, %58 : vector<8x128xi32>
    %60 = arith.andi %54, %59 : vector<8x128xi1>
    %61 = arith.extui %60 : vector<8x128xi1> to vector<8x128xi32>
    %62 = arith.sitofp %61 : vector<8x128xi32> to vector<8x128xf32>
    %63 = tpu.iota {dimensions = array<i32: 0>} : vector<128x8xi32>
    %64 = tpu.iota {dimensions = array<i32: 1>} : vector<128x8xi32>
    %c16_i32_22 = arith.constant 16 : i32
    %65 = vector.broadcast %c16_i32_22 : i32 to vector<128x8xi32>
    %66 = arith.muli %64, %65 : vector<128x8xi32>
    %67 = arith.cmpi sge, %63, %66 : vector<128x8xi32>
    %c1_i32_23 = arith.constant 1 : i32
    %68 = vector.broadcast %c1_i32_23 : i32 to vector<128x8xi32>
    %69 = arith.addi %64, %68 : vector<128x8xi32>
    %c16_i32_24 = arith.constant 16 : i32
    %70 = vector.broadcast %c16_i32_24 : i32 to vector<128x8xi32>
    %71 = arith.muli %69, %70 : vector<128x8xi32>
    %72 = arith.cmpi slt, %63, %71 : vector<128x8xi32>
    %73 = arith.andi %67, %72 : vector<128x8xi1>
    %74 = arith.extui %73 : vector<128x8xi1> to vector<128x8xi32>
    %75 = arith.sitofp %74 : vector<128x8xi32> to vector<128x8xf32>
    %c0_25 = arith.constant 0 : index
    %c0_26 = arith.constant 0 : index
    %76 = vector.load %arg3[%c0_25, %c0_26] : memref<32x8xf32, #tpu.memory_space<vmem>>, vector<32x8xf32>
    %cst = arith.constant dense<0xFF800000> : vector<32xf32>
    %77 = vector.multi_reduction <maximumf>, %76, %cst [1] : vector<32x8xf32> to vector<32xf32>
    %78 = vector.shape_cast %77 : vector<32xf32> to vector<32x1xf32>
    %79 = vector.broadcast %78 : vector<32x1xf32> to vector<32x8xf32>
    %80 = arith.subf %76, %79 : vector<32x8xf32>
    %81 = math.exp %80 : vector<32x8xf32>
    %cst_27 = arith.constant dense<0.000000e+00> : vector<32xf32>
    %82 = vector.multi_reduction <add>, %81, %cst_27 [1] : vector<32x8xf32> to vector<32xf32>
    %83 = vector.shape_cast %82 : vector<32xf32> to vector<32x1xf32>
    %84 = tpu.reciprocal %83 {approx = true} : vector<32x1xf32> -> vector<32x1xf32>
    %85 = vector.broadcast %84 : vector<32x1xf32> to vector<32x8xf32>
    %86 = arith.mulf %81, %85 : vector<32x8xf32>
    %cst_28 = arith.constant dense<0.000000e+00> : vector<32x128xf32>
    %87 = tpu.matmul %86, %62, %cst_28 {dimension_numbers = #tpu.dot_dimension_numbers<[1], [0], [0], [1], [0, 0, 1, 1], [], []>} : vector<32x8xf32>, vector<8x128xf32>, vector<32x128xf32> -> vector<32x128xf32>
    %c0_29 = arith.constant 0 : index
    %c0_30 = arith.constant 0 : index
    %88 = vector.load %arg5[%c0_29, %c0_30] : memref<32x128xf32, #tpu.memory_space<vmem>>, vector<32x128xf32>
    %89 = arith.mulf %87, %88 : vector<32x128xf32>
    %cst_31 = arith.constant dense<0.000000e+00> : vector<128xf32>
    %90 = vector.multi_reduction <add>, %89, %cst_31 [0] : vector<32x128xf32> to vector<128xf32>
    %91 = vector.shape_cast %90 : vector<128xf32> to vector<1x128xf32>
    %92 = arith.mulf %91, %91 : vector<1x128xf32>
    %cst_32 = arith.constant dense<0.000000e+00> : vector<1x8xf32>
    %93 = tpu.matmul %92, %75, %cst_32 {dimension_numbers = #tpu.dot_dimension_numbers<[1], [0], [0], [1], [0, 0, 1, 1], [], []>} : vector<1x128xf32>, vector<128x8xf32>, vector<1x8xf32> -> vector<1x8xf32>
    %cst_33 = arith.constant 1.000000e+00 : f32
    %94 = vector.broadcast %cst_33 : f32 to vector<1x8xf32>
    %95 = arith.addf %94, %93 : vector<1x8xf32>
    %96 = tpu.reciprocal %95 {approx = true} : vector<1x8xf32> -> vector<1x8xf32>
    %97 = arith.mulf %93, %96 : vector<1x8xf32>
    %cst_34 = arith.constant 9.99999996E-13 : f32
    %98 = vector.broadcast %cst_34 : f32 to vector<1x8xf32>
    %99 = arith.addf %93, %98 : vector<1x8xf32>
    %100 = math.rsqrt %99 : vector<1x8xf32>
    %101 = arith.mulf %97, %100 : vector<1x8xf32>
    %cst_35 = arith.constant dense<0.000000e+00> : vector<1x128xf32>
    %102 = tpu.matmul %101, %62, %cst_35 {dimension_numbers = #tpu.dot_dimension_numbers<[1], [0], [0], [1], [0, 0, 1, 1], [], []>} : vector<1x8xf32>, vector<8x128xf32>, vector<1x128xf32> -> vector<1x128xf32>
    %103 = arith.mulf %91, %102 : vector<1x128xf32>
    %c0_36 = arith.constant 0 : index
    %c0_37 = arith.constant 0 : index
    %104 = vector.load %arg5[%c0_36, %c0_37] : memref<32x128xf32, #tpu.memory_space<vmem>>, vector<32x128xf32>
    %105 = vector.broadcast %103 : vector<1x128xf32> to vector<32x128xf32>
    %106 = arith.mulf %104, %105 : vector<32x128xf32>
    %cst_38 = arith.constant dense<0.000000e+00> : vector<32x8xf32>
    %107 = tpu.matmul %106, %75, %cst_38 {dimension_numbers = #tpu.dot_dimension_numbers<[1], [0], [0], [1], [0, 0, 1, 1], [], []>} : vector<32x128xf32>, vector<128x8xf32>, vector<32x8xf32> -> vector<32x8xf32>
    %108 = arith.addf %76, %107 : vector<32x8xf32>
    %cst_39 = arith.constant dense<0xFF800000> : vector<32xf32>
    %109 = vector.multi_reduction <maximumf>, %108, %cst_39 [1] : vector<32x8xf32> to vector<32xf32>
    %110 = vector.shape_cast %109 : vector<32xf32> to vector<32x1xf32>
    %111 = vector.broadcast %110 : vector<32x1xf32> to vector<32x8xf32>
    %112 = arith.subf %108, %111 : vector<32x8xf32>
    %113 = math.exp %112 : vector<32x8xf32>
    %cst_40 = arith.constant dense<0.000000e+00> : vector<32xf32>
    %114 = vector.multi_reduction <add>, %113, %cst_40 [1] : vector<32x8xf32> to vector<32xf32>
    %115 = vector.shape_cast %114 : vector<32xf32> to vector<32x1xf32>
    %116 = tpu.reciprocal %115 {approx = true} : vector<32x1xf32> -> vector<32x1xf32>
    %117 = vector.broadcast %116 : vector<32x1xf32> to vector<32x8xf32>
    %118 = arith.mulf %113, %117 : vector<32x8xf32>
    %cst_41 = arith.constant dense<0.000000e+00> : vector<32x128xf32>
    %119 = tpu.matmul %118, %62, %cst_41 {dimension_numbers = #tpu.dot_dimension_numbers<[1], [0], [0], [1], [0, 0, 1, 1], [], []>} : vector<32x8xf32>, vector<8x128xf32>, vector<32x128xf32> -> vector<32x128xf32>
    %120 = arith.mulf %119, %104 : vector<32x128xf32>
    %cst_42 = arith.constant dense<0.000000e+00> : vector<128xf32>
    %121 = vector.multi_reduction <add>, %120, %cst_42 [0] : vector<32x128xf32> to vector<128xf32>
    %122 = vector.shape_cast %121 : vector<128xf32> to vector<1x128xf32>
    %123 = arith.mulf %122, %122 : vector<1x128xf32>
    %cst_43 = arith.constant dense<0.000000e+00> : vector<1x8xf32>
    %124 = tpu.matmul %123, %75, %cst_43 {dimension_numbers = #tpu.dot_dimension_numbers<[1], [0], [0], [1], [0, 0, 1, 1], [], []>} : vector<1x128xf32>, vector<128x8xf32>, vector<1x8xf32> -> vector<1x8xf32>
    %cst_44 = arith.constant 1.000000e+00 : f32
    %125 = vector.broadcast %cst_44 : f32 to vector<1x8xf32>
    %126 = arith.addf %125, %124 : vector<1x8xf32>
    %127 = tpu.reciprocal %126 {approx = true} : vector<1x8xf32> -> vector<1x8xf32>
    %128 = arith.mulf %124, %127 : vector<1x8xf32>
    %cst_45 = arith.constant 9.99999996E-13 : f32
    %129 = vector.broadcast %cst_45 : f32 to vector<1x8xf32>
    %130 = arith.addf %124, %129 : vector<1x8xf32>
    %131 = math.rsqrt %130 : vector<1x8xf32>
    %132 = arith.mulf %128, %131 : vector<1x8xf32>
    %cst_46 = arith.constant dense<0.000000e+00> : vector<1x128xf32>
    %133 = tpu.matmul %132, %62, %cst_46 {dimension_numbers = #tpu.dot_dimension_numbers<[1], [0], [0], [1], [0, 0, 1, 1], [], []>} : vector<1x8xf32>, vector<8x128xf32>, vector<1x128xf32> -> vector<1x128xf32>
    %134 = arith.mulf %122, %133 : vector<1x128xf32>
    %c0_47 = arith.constant 0 : index
    %c0_48 = arith.constant 0 : index
    %135 = vector.load %arg5[%c0_47, %c0_48] : memref<32x128xf32, #tpu.memory_space<vmem>>, vector<32x128xf32>
    %136 = vector.broadcast %134 : vector<1x128xf32> to vector<32x128xf32>
    %137 = arith.mulf %135, %136 : vector<32x128xf32>
    %cst_49 = arith.constant dense<0.000000e+00> : vector<32x8xf32>
    %138 = tpu.matmul %137, %75, %cst_49 {dimension_numbers = #tpu.dot_dimension_numbers<[1], [0], [0], [1], [0, 0, 1, 1], [], []>} : vector<32x128xf32>, vector<128x8xf32>, vector<32x8xf32> -> vector<32x8xf32>
    %139 = arith.addf %108, %138 : vector<32x8xf32>
    %cst_50 = arith.constant dense<0xFF800000> : vector<32xf32>
    %140 = vector.multi_reduction <maximumf>, %139, %cst_50 [1] : vector<32x8xf32> to vector<32xf32>
    %141 = vector.shape_cast %140 : vector<32xf32> to vector<32x1xf32>
    %142 = vector.broadcast %141 : vector<32x1xf32> to vector<32x8xf32>
    %143 = arith.subf %139, %142 : vector<32x8xf32>
    %144 = math.exp %143 : vector<32x8xf32>
    %cst_51 = arith.constant dense<0.000000e+00> : vector<32xf32>
    %145 = vector.multi_reduction <add>, %144, %cst_51 [1] : vector<32x8xf32> to vector<32xf32>
    %146 = vector.shape_cast %145 : vector<32xf32> to vector<32x1xf32>
    %147 = tpu.reciprocal %146 {approx = true} : vector<32x1xf32> -> vector<32x1xf32>
    %148 = vector.broadcast %147 : vector<32x1xf32> to vector<32x8xf32>
    %149 = arith.mulf %144, %148 : vector<32x8xf32>
    %cst_52 = arith.constant dense<0.000000e+00> : vector<32x128xf32>
    %150 = tpu.matmul %149, %62, %cst_52 {dimension_numbers = #tpu.dot_dimension_numbers<[1], [0], [0], [1], [0, 0, 1, 1], [], []>} : vector<32x8xf32>, vector<8x128xf32>, vector<32x128xf32> -> vector<32x128xf32>
    %151 = arith.mulf %150, %135 : vector<32x128xf32>
    %cst_53 = arith.constant dense<0.000000e+00> : vector<128xf32>
    %152 = vector.multi_reduction <add>, %151, %cst_53 [0] : vector<32x128xf32> to vector<128xf32>
    %153 = vector.shape_cast %152 : vector<128xf32> to vector<1x128xf32>
    %154 = arith.mulf %153, %153 : vector<1x128xf32>
    %cst_54 = arith.constant dense<0.000000e+00> : vector<1x8xf32>
    %155 = tpu.matmul %154, %75, %cst_54 {dimension_numbers = #tpu.dot_dimension_numbers<[1], [0], [0], [1], [0, 0, 1, 1], [], []>} : vector<1x128xf32>, vector<128x8xf32>, vector<1x8xf32> -> vector<1x8xf32>
    %cst_55 = arith.constant 1.000000e+00 : f32
    %156 = vector.broadcast %cst_55 : f32 to vector<1x8xf32>
    %157 = arith.addf %156, %155 : vector<1x8xf32>
    %158 = tpu.reciprocal %157 {approx = true} : vector<1x8xf32> -> vector<1x8xf32>
    %159 = arith.mulf %155, %158 : vector<1x8xf32>
    %cst_56 = arith.constant 9.99999996E-13 : f32
    %160 = vector.broadcast %cst_56 : f32 to vector<1x8xf32>
    %161 = arith.addf %155, %160 : vector<1x8xf32>
    %162 = math.rsqrt %161 : vector<1x8xf32>
    %163 = arith.mulf %159, %162 : vector<1x8xf32>
    %cst_57 = arith.constant dense<0.000000e+00> : vector<1x128xf32>
    %164 = tpu.matmul %163, %62, %cst_57 {dimension_numbers = #tpu.dot_dimension_numbers<[1], [0], [0], [1], [0, 0, 1, 1], [], []>} : vector<1x8xf32>, vector<8x128xf32>, vector<1x128xf32> -> vector<1x128xf32>
    %165 = arith.mulf %153, %164 : vector<1x128xf32>
    %c0_58 = arith.constant 0 : index
    %c0_59 = arith.constant 0 : index
    %166 = vector.load %arg5[%c0_58, %c0_59] : memref<32x128xf32, #tpu.memory_space<vmem>>, vector<32x128xf32>
    %167 = vector.broadcast %165 : vector<1x128xf32> to vector<32x128xf32>
    %168 = arith.mulf %166, %167 : vector<32x128xf32>
    %cst_60 = arith.constant dense<0.000000e+00> : vector<32x8xf32>
    %169 = tpu.matmul %168, %75, %cst_60 {dimension_numbers = #tpu.dot_dimension_numbers<[1], [0], [0], [1], [0, 0, 1, 1], [], []>} : vector<32x128xf32>, vector<128x8xf32>, vector<32x8xf32> -> vector<32x8xf32>
    %170 = arith.addf %139, %169 : vector<32x8xf32>
    %cst_61 = arith.constant dense<0xFF800000> : vector<32xf32>
    %171 = vector.multi_reduction <maximumf>, %170, %cst_61 [1] : vector<32x8xf32> to vector<32xf32>
    %172 = vector.shape_cast %171 : vector<32xf32> to vector<32x1xf32>
    %173 = vector.broadcast %172 : vector<32x1xf32> to vector<32x8xf32>
    %174 = arith.subf %170, %173 : vector<32x8xf32>
    %175 = math.exp %174 : vector<32x8xf32>
    %cst_62 = arith.constant dense<0.000000e+00> : vector<32xf32>
    %176 = vector.multi_reduction <add>, %175, %cst_62 [1] : vector<32x8xf32> to vector<32xf32>
    %177 = vector.shape_cast %176 : vector<32xf32> to vector<32x1xf32>
    %178 = tpu.reciprocal %177 {approx = true} : vector<32x1xf32> -> vector<32x1xf32>
    %179 = vector.broadcast %178 : vector<32x1xf32> to vector<32x8xf32>
    %180 = arith.mulf %175, %179 : vector<32x8xf32>
    %cst_63 = arith.constant dense<0.000000e+00> : vector<32x128xf32>
    %181 = tpu.matmul %180, %62, %cst_63 {dimension_numbers = #tpu.dot_dimension_numbers<[1], [0], [0], [1], [0, 0, 1, 1], [], []>} : vector<32x8xf32>, vector<8x128xf32>, vector<32x128xf32> -> vector<32x128xf32>
    %182 = arith.mulf %181, %166 : vector<32x128xf32>
    %cst_64 = arith.constant dense<0.000000e+00> : vector<128xf32>
    %183 = vector.multi_reduction <add>, %182, %cst_64 [0] : vector<32x128xf32> to vector<128xf32>
    %184 = vector.shape_cast %183 : vector<128xf32> to vector<1x128xf32>
    %185 = arith.mulf %184, %184 : vector<1x128xf32>
    %cst_65 = arith.constant dense<0.000000e+00> : vector<1x8xf32>
    %186 = tpu.matmul %185, %75, %cst_65 {dimension_numbers = #tpu.dot_dimension_numbers<[1], [0], [0], [1], [0, 0, 1, 1], [], []>} : vector<1x128xf32>, vector<128x8xf32>, vector<1x8xf32> -> vector<1x8xf32>
    %cst_66 = arith.constant 1.000000e+00 : f32
    %187 = vector.broadcast %cst_66 : f32 to vector<1x8xf32>
    %188 = arith.addf %187, %186 : vector<1x8xf32>
    %189 = tpu.reciprocal %188 {approx = true} : vector<1x8xf32> -> vector<1x8xf32>
    %190 = arith.mulf %186, %189 : vector<1x8xf32>
    %cst_67 = arith.constant 9.99999996E-13 : f32
    %191 = vector.broadcast %cst_67 : f32 to vector<1x8xf32>
    %192 = arith.addf %186, %191 : vector<1x8xf32>
    %193 = math.rsqrt %192 : vector<1x8xf32>
    %194 = arith.mulf %190, %193 : vector<1x8xf32>
    %cst_68 = arith.constant dense<0.000000e+00> : vector<1x128xf32>
    %195 = tpu.matmul %194, %62, %cst_68 {dimension_numbers = #tpu.dot_dimension_numbers<[1], [0], [0], [1], [0, 0, 1, 1], [], []>} : vector<1x8xf32>, vector<8x128xf32>, vector<1x128xf32> -> vector<1x128xf32>
    %196 = arith.mulf %184, %195 : vector<1x128xf32>
    %c0_69 = arith.constant 0 : index
    %c0_70 = arith.constant 0 : index
    %c0_71 = arith.constant 0 : index
    %197 = vector.load %arg4[%c0_69, %c0_70, %c0_71] : memref<1x1x128xf32, #tpu.memory_space<vmem>>, vector<1x1x128xf32>
    %198 = vector.shape_cast %197 : vector<1x1x128xf32> to vector<1x128xf32>
    %199 = vector.shape_cast %196 : vector<1x128xf32> to vector<1x1x128xf32>
    tpu.vector_store %arg4[%c0_69, %c0_70, %c0_71], %199 {strides = array<i32>} : memref<1x1x128xf32, #tpu.memory_space<vmem>>, vector<1x1x128xf32>,
    return
  }
  func.func @transform_0(%arg0: i32) -> (i32, i32, i32) {
    %c0_i32 = arith.constant 0 : i32
    %c0_i32_0 = arith.constant 0 : i32
    %c0_i32_1 = arith.constant 0 : i32
    return %arg0, %c0_i32, %c0_i32_0 : i32, i32, i32
  }
  func.func @transform_1(%arg0: i32) -> (i32, i32, i32) {
    %c0_i32 = arith.constant 0 : i32
    %c0_i32_0 = arith.constant 0 : i32
    %c0_i32_1 = arith.constant 0 : i32
    %c0_i32_2 = arith.constant 0 : i32
    return %c0_i32, %c0_i32_0, %c0_i32_1 : i32, i32, i32
  }
  func.func @transform_2(%arg0: i32) -> (i32, i32) {
    %c0_i32 = arith.constant 0 : i32
    %c0_i32_0 = arith.constant 0 : i32
    %c0_i32_1 = arith.constant 0 : i32
    return %c0_i32, %c0_i32_0 : i32, i32
  }
  func.func @transform_3(%arg0: i32) -> (i32, i32, i32) {
    %c0_i32 = arith.constant 0 : i32
    %c0_i32_0 = arith.constant 0 : i32
    %c0_i32_1 = arith.constant 0 : i32
    return %arg0, %c0_i32, %c0_i32_0 : i32, i32, i32
  }
}

</mosaic_0001>

<bundles_post_ra>
// kernel: tpu_custom_call.1
= control target key start
LH: loop header
LB: loop body
LE: loop exit
PB: predicated region body
PF: predicated region fallthrough
CT: control target
= control target key end

     0   :  { %8 = vsyncpa [#allocation4], 0  ;;  %s4138_s0 = inlined_call_operand.vmem [shape: f32[2,32,8], index: 0, kind: input, shape index: {}]   ;;  %s4139_s1 = inlined_call_operand.hbm [shape: f32[8,32,128], index: 1, kind: input, shape index: {}]   ;;  %s4140_s2 = inlined_call_operand.vmem [shape: f32[32,8], index: 2, kind: input, shape index: {}]   ;;  %s4141_s3 = inlined_call_operand.hbm [shape: f32[2,1,128], index: 3, kind: output, shape index: {}]  }
   0x1   :  { %9 = vsyncpa [#allocation5], 0 }
   0x2   :  { %11 = vsyncpa [#allocation5 + $0x1], 0  ;;  %s3061_s12 = smov 0   ;;  %s3063_s13 = smov 0  }
   0x3   :  { %s3065_s14 = smov 0   ;;  %s3067_s15 = smov 0  }
   0x4 LB: > { %s3082_s16 = sadd.s32 4294967295, %s3024_s15   ;;  %s2133_s17 = sadd.s32 4294967294, %s3024_s15   ;;  %s3024_s15 = sphi %s3067_s15, %s4316_s15   ;;  %s3020_s14 = sphi %s3065_s14, %s4315_s14   ;;  %s3016_s13 = sphi %s3063_s13, %s4314_s13   ;;  %s3012_s12 = sphi %s3061_s12, %s4313_s12  }
   0x5   : > { %s3086_s18 = sadd.s32 1, %s3024_s15   ;;  %s92_s19 = sadd.s32 1, %s3020_s14 }
   0x6   : > { %s89_s20 = ssub.s32 %s3024_s15, %s3086_s18  ;;  %p102_p0 = scmp.ne.s32.totalorder %s3020_s14, %s3016_s13 }
   0x7   : > { %p90_p1 = scmp.eq.s32.totalorder %s89_s20, 0  ;;  %p103_p2 = scmp.eq.s32.totalorder %s3082_s16, 1 }
   0x8   : > { %p108_p3 = scmp.ne.s32.totalorder %s3016_s13, %s3012_s12  ;;  %p109_p4 = scmp.eq.s32.totalorder %s2133_s17, 1 }
   0x9   : > { %s3097_s21 = scalar_select %p90_p1, %s3020_s14, %s92_s19  }
   0xa   : > { %p3099_p5 = por %p103_p2, %p102_p0  ;;  %p3103_p6 = por %p109_p4, %p108_p3 }
   0xb   : > { %p2134_p7 = scmp.ge.s32.totalorder %s3024_s15, 1  ;;  %p116_p8 = scmp.lt.s32.totalorder %s3024_s15, 3 }
   0xc   : > { %s4197_s23 = scalar_select %p3103_p6, 1, 0 }
   0xd   : > { %p2778_p9 = scmp.eq.s32.totalorder %s3082_s16, 0  ;;  %p3110_p10 = pnand %p2134_p7, %p116_p8 }
   0xe   : > { %s3026_s25 = smov [#allocation3]  }
   0xf   : > { %s128_s26 = sshll.u32 %s3026_s25, 4  ;;  %p2770_p11 = pneg %p3110_p10  ;;  %s129_s26 = int_to_ptr.vmem [resolvable:$true] %s128_s26 }
  0x10   : > { %s2945_s27 = scalar_lea.vmem %s129_s26, 4096  ;;  %p2953_p3 = scmp.lt.s32.totalorder %s129_s26, %s129_s26 }
  0x11   : > { %p2771_p12 = pnand %p2778_p9, %p2770_p11  ;;  %p2946_p0 = scmp.ne.s32.totalorder %s129_s26, %s2945_s27 }
  0x12   : > { %p2954_p4 = scmp.lt.s32.totalorder %s2945_s27, %s2945_s27 }
  0x13   : > { %p2936_p13 = pneg %p2771_p12 }
  0x14   : > { %p2955_p6 = por %p2954_p4, %p2953_p3 }
  0x15   : > { %p2948_p1 = pnand %p2946_p0, %p2936_p13 }
  0x17   : > { %p2949_p2 = pneg %p2948_p1 }
  0x19   : > { %p2956_p7 = pnand %p2955_p6, %p2949_p2 }
  0x1b   : > { %2959 = shalt.err (!%p2956_p7)
}
  0x1c   : > { %s3027_s28 = smov 128   ;;  %s3028_s29 = smov 8  }
  0x1d   : > { %2773 = dma.hbm_to_vmem [thread:$0]  (!%p2771_p12), %s4139_s1, 4096, %s129_s26, [#allocation4], %s3027_s28, %s3027_s28, %s3028_s29  }
  0x1e   : > { %155 = sbr.rel (%p3110_p10) target bundleno = 4420 (0x1144), region = 32 }
  0x23   : > { %3003 = dma.done.wait (%p2778_p9), [#allocation4], 4096  }
  0x24   : > { %3005 = vsyncadd (%p2778_p9), [#allocation4], 4294963200  ;;  %vm4142_vm0 = vcmask 64512   ;;  %v3130_v0 = vld [vmem:[%s4140_s2] sm:$0xff]  ;;  %v3135_v1 = vld [vmem:[%s4140_s2 + $0x10] sm:$0xff]  ;;  %v3029_v8 = vmov 0   ;;  %v422_v29 = vlaneseq }
  0x25   : > { %4199 = vst [vmem:[#allocation9_spill] sm:$0xff] %v3130_v0  ;;  %4200 = vst [vmem:[#allocation10_spill] sm:$0xff] %v3135_v1  ;;  %v3140_v2 = vld [vmem:[%s4140_s2 + $0x8] sm:$0xff]  ;;  %v537_v3 = vsel %vm4142_vm0, %v3130_v0, -inf  ;;  %v543_v4 = vsel %vm4142_vm0, %v3135_v1, -inf  ;;  %v3149_v5 = vld [vmem:[%s4140_s2 + $0x18] sm:$0xff]  ;;  %2828 = vset.pattern.permute.xlu1 %v3029_v8  ;;  %2827 = vset.pattern.permute.xlu0 %v3029_v8 }
  0x26   : > { %4201 = vst [vmem:[#allocation11_spill] sm:$0xff] %v3140_v2  ;;  %4202 = vst [vmem:[#allocation12_spill] sm:$0xff] %v3149_v5  ;;  %538 = vmax.xlane.f32.xlu0 %v537_v3  ;;  %544 = vmax.xlane.f32.xlu1 %v543_v4  ;;  %v540_v6 = vsel %vm4142_vm0, %v3140_v2, -inf  ;;  %v546_v7 = vsel %vm4142_vm0, %v3149_v5, -inf  ;;  %p178_p6 = scmp.lt.s32.totalorder %s3082_s16, 1  ;;  %v3182_v30 = vshrl.u32 %v422_v29, 7 }
  0x27   : > { %v3190_v34 = vand.u32 127, %v422_v29  ;;  %v4204_v37 = vmov 0  ;;  %v3030_v38 = vmov 1   ;;  %v4159_v39 = vmov 1.0   ;;  %s176_s27 = sand.u32 1, %s3016_s13   ;;  %s2298_s28 = sshll.u32 %s3082_s16, 4 }
  0x28   : > { %s179_s19 = scalar_select %p178_p6, %s3082_s16, 1  ;;  %4203 = vst [vmem:[#allocation13_spill] sm:$0xff] %v3182_v30  ;;  %v428_v32 = vadd.s32 1, %v3182_v30  ;;  %v426_v35 = vmul.u32 16, %v3182_v30  ;;  %v3032_v41 = vmov 3   ;;  %v3033_v43 = vmov 4  }
  0x29   : > { %v3034_v44 = vmov 2   ;;  %v3035_v45 = vmov 5   ;;  %v3036_v46 = vmov 6   ;;  %v3037_v47 = vmov 7   ;;  %s177_s29 = scalar_lea.vmem [#allocation6], %s176_s27  ;;  %s4103_s6 = scalar_lea.hbm %s4141_s3, %s2298_s28 }
  0x2a   : > { %541 = vmax.xlane.f32.xlu0 %v540_v6  ;;  %547 = vmax.xlane.f32.xlu1 %v546_v7  ;;  %s2301_s20 = sshll.u32 %s179_s19, 5  ;;  %v429_v36 = vmul.u32 16, %v428_v32  ;;  %vm427_vm1 = vcmp.ge.s32.totalorder %v3190_v34, %v426_v35  ;;  %v466_v48 = vadd.s32 1, %v3190_v34  ;;  %v3224_v49 = vmul.u32 16, %v3190_v34  ;;  %s2066_s30 = sshll.u32 %s177_s29, 4  ;;  %s2067_s30 = int_to_ptr.vmem [resolvable:$true] %s2066_s30 }
  0x2b   : > { %s182_s26 = scalar_lea.vmem %s4138_s0, %s2301_s20  ;;  %v448_v51 = vadd.s32 120, %v3182_v30  ;;  %v447_v52 = vadd.s32 112, %v3182_v30  ;;  %v4157_v53 = vmov 0.0   ;;  %v4227_v29 = vmov 0  ;;  %s2054_s7 = scalar_lea.sflag [#allocation5], %s176_s27 }
  0x2c   : > { %v3184_v31 = vld [vmem:[%s182_s26 + $0x8] sm:$0xff]  ;;  %v3188_v33 = vld [vmem:[%s182_s26] sm:$0xff]  ;;  %vm430_vm2 = vcmp.lt.s32.totalorder %v3190_v34, %v429_v36  ;;  %v186_v40 = vld [vmem:[%s182_s26 + $0x18] sm:$0xff]  ;;  %v3226_v50 = vmul.u32 16, %v466_v48  ;;  %2466 = vmatprep.subr.mxu1 %v4157_v53  ;;  %v435_v34 = vadd.s32 16, %v3182_v30  ;;  %v434_v35 = vadd.s32 8, %v3182_v30 }
  0x2d   : > { %vm3196_vm3 = vmand %vm427_vm1, %vm430_vm2  ;;  %v185_v42 = vld [vmem:[%s182_s26 + $0x10] sm:$0xff]  ;;  %vm465_vm4 = vcmp.ge.s32.totalorder %v448_v51, %v3224_v49  ;;  %vm464_vm6 = vcmp.ge.s32.totalorder %v447_v52, %v3224_v49  ;;  %v4231_v36 = vmov 0  ;;  %s2960_s8 = scalar_lea.vmem %s2067_s30, 16  ;;  %s3040_s9 = smov [#allocation6]  }
  0x2e   : > { %v4205_v37 = vsel %vm3196_vm3, 4294967295, %v4204_v37  ;;  %2458 = vmatprep.subr.msk.mxu0 %vm3196_vm3, %v4159_v39  ;;  %vm483_vm5 = vcmp.lt.s32.totalorder %v448_v51, %v3226_v50  ;;  %vm482_vm7 = vcmp.lt.s32.totalorder %v447_v52, %v3226_v50  ;;  %p2961_p8 = scmp.ne.s32.totalorder %s2067_s30, %s2960_s8  ;;  %s2964_s16 = sshll.u32 %s3040_s9, 4  ;;  %s2965_s16 = int_to_ptr.vmem [resolvable:$false] %s2964_s16 }
  0x2f   : > { %4206 = vst [vmem:[#allocation14_spill] sm:$0xff] %v4205_v37  ;;  %2459 = vmatpush3.msk.msra.mxu0 %vm3196_vm3, %v4159_v39  ;;  %vm3235_vm8 = vmand %vm465_vm4, %vm483_vm5  ;;  %v276_v37 = vld [vmem:[#allocation3 + $0x70] sm:$0xff]  ;;  %s2966_s10 = scalar_lea.vmem %s2965_s16, 32  ;;  %p2967_p11 = scmp.lt.s32.totalorder %s2067_s30, %s2965_s16 }
  0x30   : > { %2501 = vmatprep.subr.mxu0 %v4157_v53  ;;  %2467 = vmatpush3.msk.msra.mxu1 %vm3235_vm8, %v4159_v39  ;;  %vm3243_vm9 = vmand %vm464_vm6, %vm482_vm7  ;;  %p2962_p9 = pnand %p2961_p8, %p3099_p5  ;;  %p2968_p12 = scmp.lt.s32.totalorder %s2966_s10, %s2960_s8 }
  0x31   : > { %2468 = vmatprep.subr.mxu1 %v4157_v53 }
  0x32   : > { %2469 = vmatpush3.msk.msra.mxu1 %vm3243_vm9, %v4159_v39  ;;  %p2963_p10 = pneg %p2962_p9  ;;  %p2969_p13 = por %p2968_p12, %p2967_p11 }
  0x33   : > { %2470 = vmatprep.subr.mxu1 %v4157_v53 }
  0x34   : > { %p2970_p0 = pnand %p2969_p13, %p2963_p10 }
  0xaf   : > { %v539_v9 = vpop.xlane.xlu0 %538  ;;  %v545_v10 = vpop.xlane.xlu1 %544 }
  0xb0   : > { %v549_v11 = vsub.f32 %v3130_v0, %v539_v9  ;;  %v551_v12 = vsub.f32 %v3135_v1, %v545_v10  ;;  %v445_v9 = vadd.s32 96, %v3182_v30  ;;  %v248_v0 = vld [vmem:[#allocation3 + $0x58] sm:$0xff] }
  0xb2   : > { %v553_v13 = vmul.f32 1.442695, %v549_v11  ;;  %v557_v14 = vmul.f32 1.442695, %v551_v12  ;;  %vm462_vm13 = vcmp.ge.s32.totalorder %v445_v9, %v3224_v49  ;;  %vm480_vm14 = vcmp.lt.s32.totalorder %v445_v9, %v3226_v50  ;;  %v189_v9 = vld [vmem:[#allocation3 + $0x10] sm:$0xff] }
  0xb3   : > { %v542_v15 = vpop.xlane.xlu0 %541  ;;  %v548_v16 = vpop.xlane.xlu1 %547  ;;  %v444_v12 = vadd.s32 88, %v3182_v30  ;;  %vm3283_vm15 = vmand %vm462_vm13, %vm480_vm14 }
  0xb4   : > { %2854 = vpow2.f32 %v553_v13  ;;  %v550_v17 = vsub.f32 %v3140_v2, %v542_v15  ;;  %v552_v18 = vsub.f32 %v3149_v5, %v548_v16  ;;  %v442_v16 = vadd.s32 72, %v3182_v30  ;;  %v275_v2 = vld [vmem:[#allocation3 + $0x68] sm:$0xff] }
  0xb5   : > { %2856 = vpow2.f32 %v557_v14  ;;  %vm461_vm1 = vcmp.ge.s32.totalorder %v444_v12, %v3224_v49  ;;  %vm479_vm2 = vcmp.lt.s32.totalorder %v444_v12, %v3226_v50  ;;  %v443_v14 = vadd.s32 80, %v3182_v30  ;;  %v218_v12 = vld [vmem:[#allocation3 + $0x30] sm:$0xff] }
  0xb6   : > { %v555_v19 = vmul.f32 1.442695, %v550_v17  ;;  %v559_v20 = vmul.f32 1.442695, %v552_v18  ;;  %vm3294_vm4 = vmand %vm461_vm1, %vm479_vm2 }
  0xb7   : > { %vm460_vm5 = vcmp.ge.s32.totalorder %v443_v14, %v3224_v49  ;;  %vm478_vm6 = vcmp.lt.s32.totalorder %v443_v14, %v3226_v50  ;;  %v245_v14 = vld [vmem:[#allocation3 + $0x40] sm:$0xff] }
  0xb8   : > { %2858 = vpow2.f32 %v555_v19  ;;  %vm3307_vm7 = vmand %vm460_vm5, %vm478_vm6  ;;  %v441_v19 = vadd.s32 64, %v3182_v30 }
  0xb9   : > { %2860 = vpow2.f32 %v559_v20  ;;  %v4219_v20 = vmov 0 }
  0xba   : > { %vm458_vm14 = vcmp.ge.s32.totalorder %v441_v19, %v3224_v49  ;;  %vm476_vm1 = vcmp.lt.s32.totalorder %v441_v19, %v3226_v50 }
  0xbb   : > { %vm3329_vm2 = vmand %vm458_vm14, %vm476_vm1 }
  0xc1   : > { %v3161_v21 = vpop.eup %2854 }
  0xc2   : > { %v3163_v22 = vpop.eup %2856  ;;  %v561_v23 = vsel %vm4142_vm0, %v3161_v21, 0.0 }
  0xc3   : > { %562 = vadd.xlane.f32.xlu0 %v561_v23  ;;  %v567_v24 = vsel %vm4142_vm0, %v3163_v22, 0.0  ;;  %v439_v23 = vadd.s32 48, %v3182_v30 }
  0xc5   : > { %v3169_v25 = vpop.eup %2858  ;;  %vm474_vm14 = vcmp.lt.s32.totalorder %v439_v23, %v3226_v50 }
  0xc6   : > { %v3171_v26 = vpop.eup %2860  ;;  %v564_v27 = vsel %vm4142_vm0, %v3169_v25, 0.0 }
  0xc7   : > { %568 = vadd.xlane.f32.xlu0 %v567_v24  ;;  %565 = vadd.xlane.f32.xlu1 %v564_v27  ;;  %v570_v28 = vsel %vm4142_vm0, %v3171_v26, 0.0  ;;  %v4225_v27 = vmov 0 }
  0xcb   : > { %571 = vadd.xlane.f32.xlu1 %v570_v28  ;;  %v437_v28 = vadd.s32 32, %v3182_v30 }
  0xdc   : > { %198 = vperm.xlu1 %2828, %v3184_v31  }
  0xdd   : > { %193 = vperm.xlu0 %2827, %v3188_v33  }
  0xe0   : > { %2829 = vset.pattern.permute.xlu1 %v3030_v38 }
  0xe1   : > { %221 = vperm.xlu1 %2829, %v3188_v33   ;;  %2834 = vset.pattern.permute.xlu0 %v3030_v38 }
  0xe2   : > { %233 = vperm.xlu0 %2834, %v186_v40  }
  0xe5   : > { %225 = vperm.xlu1 %2829, %v3184_v31  }
  0xe6   : > { %2837 = vset.pattern.permute.xlu0 %v3032_v41 }
  0xe7   : > { %283 = vperm.xlu0 %2837, %v3184_v31  }
  0xe9   : > { %2830 = vset.pattern.permute.xlu1 %v3029_v8 }
  0xea   : > { %203 = vperm.xlu1 %2830, %v185_v42  }
  0xeb   : > { %2840 = vset.pattern.permute.xlu0 %v3033_v43 }
  0xec   : > { %308 = vperm.xlu0 %2840, %v3188_v33  }
  0xee   : > { %2831 = vset.pattern.permute.xlu1 %v3030_v38  ;;  %v4233_v38 = vmov 0 }
  0xef   : > { %229 = vperm.xlu1 %2831, %v185_v42  }
  0xf0   : > { %316 = vperm.xlu0 %2840, %v185_v42  }
  0xf3   : > { %2832 = vset.pattern.permute.xlu1 %v3034_v44 }
  0xf4   : > { %250 = vperm.xlu1 %2832, %v3188_v33   ;;  %2844 = vset.pattern.permute.xlu0 %v3035_v45 }
  0xf5   : > { %341 = vperm.xlu0 %2844, %v3184_v31  }
  0xf8   : > { %254 = vperm.xlu1 %2832, %v3184_v31  }
  0xf9   : > { %2847 = vset.pattern.permute.xlu0 %v3036_v46 }
  0xfa   : > { %366 = vperm.xlu0 %2847, %v3188_v33  }
  0xfc   : > { %2833 = vset.pattern.permute.xlu1 %v3029_v8  ;;  %v446_v8 = vadd.s32 104, %v3182_v30 }
  0xfd   : > { %208 = vperm.xlu1 %2833, %v186_v40  }
  0xfe   : > { %374 = vperm.xlu0 %2847, %v185_v42   ;;  %vm463_vm10 = vcmp.ge.s32.totalorder %v446_v8, %v3224_v49  ;;  %vm481_vm11 = vcmp.lt.s32.totalorder %v446_v8, %v3226_v50 }
  0xff   : > { %vm3272_vm12 = vmand %vm463_vm10, %vm481_vm11  ;;  %vm459_vm10 = vcmp.ge.s32.totalorder %v442_v16, %v3224_v49  ;;  %vm477_vm11 = vcmp.lt.s32.totalorder %v442_v16, %v3226_v50 }
 0x100   : > { %2471 = vmatpush3.msk.msra.mxu1 %vm3272_vm12, %v4159_v39  ;;  %vm3318_vm13 = vmand %vm459_vm10, %vm477_vm11  ;;  %vm456_vm11 = vcmp.ge.s32.totalorder %v439_v23, %v3224_v49  ;;  %v246_v23 = vld [vmem:[#allocation3 + $0x48] sm:$0xff] }
 0x101   : > { %2835 = vset.pattern.permute.xlu1 %v3034_v44  ;;  %2472 = vmatprep.subr.mxu1 %v4157_v53  ;;  %v4220_v20 = vsel %vm3318_vm13, 4294967295, %v4219_v20  ;;  %vm3353_vm1 = vmand %vm456_vm11, %vm474_vm14  ;;  %vm454_vm11 = vcmp.ge.s32.totalorder %v437_v28, %v3224_v49  ;;  %vm472_vm14 = vcmp.lt.s32.totalorder %v437_v28, %v3226_v50  ;;  %v219_v28 = vld [vmem:[#allocation3 + $0x38] sm:$0xff] }
 0x102   : > { %258 = vperm.xlu1 %2835, %v185_v42   ;;  %2851 = vset.pattern.permute.xlu0 %v3037_v47  ;;  %v4226_v27 = vsel %vm3353_vm1, 4294967295, %v4225_v27 }
 0x103   : > { %399 = vperm.xlu0 %2851, %v3184_v31   ;;  %2473 = vmatpush3.msk.msra.mxu1 %vm3283_vm15, %v4159_v39 }
 0x104   : > { %2474 = vmatprep.subr.mxu1 %v4157_v53 }
 0x105   : > { %2475 = vmatpush3.msk.msra.mxu1 %vm3294_vm4, %v4159_v39 }
 0x106   : > { %2836 = vset.pattern.permute.xlu1 %v3032_v41  ;;  %2476 = vmatprep.subr.mxu1 %v4157_v53 }
 0x107   : > { %279 = vperm.xlu1 %2836, %v3188_v33   ;;  %407 = vperm.xlu0 %2851, %v186_v40  }
 0x108   : > { %2477 = vmatpush3.msk.msra.mxu1 %vm3307_vm7, %v4159_v39 }
 0x109   : > { %2478 = vmatprep.subr.mxu1 %v4157_v53 }
 0x10a   : > { %2479 = vmatpush3.msk.msra.mxu1 %vm3318_vm13, %v4159_v39 }
 0x10b   : > { %2838 = vset.pattern.permute.xlu1 %v3034_v44  ;;  %2480 = vmatprep.subr.mxu1 %v4157_v53 }
 0x10c   : > { %262 = vperm.xlu1 %2838, %v186_v40   ;;  %2481 = vmatpush3.msk.msra.mxu1 %vm3329_vm2, %v4159_v39 }
 0x10d   : > { %2482 = vmatprep.subr.mxu1 %v4157_v53 }
 0x110   : > { %2839 = vset.pattern.permute.xlu1 %v3032_v41 }
 0x111   : > { %287 = vperm.xlu1 %2839, %v185_v42  }
 0x115   : > { %2841 = vset.pattern.permute.xlu1 %v3033_v43 }
 0x116   : > { %312 = vperm.xlu1 %2841, %v3184_v31  }
 0x11a   : > { %2842 = vset.pattern.permute.xlu1 %v3032_v41 }
 0x11b   : > { %291 = vperm.xlu1 %2842, %v186_v40  }
 0x11f   : > { %2843 = vset.pattern.permute.xlu1 %v3035_v45 }
 0x120   : > { %337 = vperm.xlu1 %2843, %v3188_v33  }
 0x124   : > { %2845 = vset.pattern.permute.xlu1 %v3033_v43 }
 0x125   : > { %320 = vperm.xlu1 %2845, %v186_v40  }
 0x129   : > { %2846 = vset.pattern.permute.xlu1 %v3035_v45 }
 0x12a   : > { %345 = vperm.xlu1 %2846, %v185_v42  }
 0x12e   : > { %2848 = vset.pattern.permute.xlu1 %v3036_v46 }
 0x12f   : > { %370 = vperm.xlu1 %2848, %v3184_v31   ;;  %v436_v31 = vadd.s32 24, %v3182_v30 }
 0x133   : > { %2849 = vset.pattern.permute.xlu1 %v3035_v45 }
 0x134   : > { %349 = vperm.xlu1 %2849, %v186_v40  }
 0x138   : > { %2850 = vset.pattern.permute.xlu1 %v3037_v47 }
 0x139   : > { %395 = vperm.xlu1 %2850, %v3188_v33   ;;  %v4229_v33 = vmov 0 }
 0x13d   : > { %2852 = vset.pattern.permute.xlu1 %v3036_v46 }
 0x13e   : > { %378 = vperm.xlu1 %2852, %v186_v40   ;;  %v4235_v40 = vmov 0 }
 0x142   : > { %2853 = vset.pattern.permute.xlu1 %v3037_v47 }
 0x143   : > { %403 = vperm.xlu1 %2853, %v185_v42   ;;  %v4237_v42 = vmov 0 }
 0x14c   : > { %v563_v56 = vpop.xlane.xlu0 %562 }
 0x14d   : > { %2862 = vrcp.f32 %v563_v56 }
 0x150   : > { %v566_v57 = vpop.xlane.xlu1 %565  ;;  %v569_v58 = vpop.xlane.xlu0 %568 }
 0x151   : > { %2864 = vrcp.f32 %v566_v57 }
 0x152   : > { %2866 = vrcp.f32 %v569_v58 }
 0x154   : > { %v572_v59 = vpop.xlane.xlu1 %571 }
 0x155   : > { %2868 = vrcp.f32 %v572_v59 }
 0x158   : > { %v3270_v10 = vpop.permute.xlu1 %198  ;;  %v194_v51 = vpop.permute.xlu0 %193 }
 0x15a   : > { %v2863_v60 = vpop.eup %2862 }
 0x15b   : > { %v577_v61 = vmul.f32 %v2863_v60, %v3161_v21  ;;  %v440_v21 = vadd.s32 56, %v3182_v30 }
 0x15c   : > { %v3304_v17 = vpop.permute.xlu1 %221 }
 0x15d   : > { %2460 = vmatprep.mubr.msk.f32.mxu0 %vm4142_vm0, %v577_v61  ;;  %vm457_vm5 = vcmp.ge.s32.totalorder %v440_v21, %v3224_v49  ;;  %vm475_vm6 = vcmp.lt.s32.totalorder %v440_v21, %v3226_v50  ;;  %v234_v56 = vpop.permute.xlu0 %233 }
 0x15e   : > { %v2865_v62 = vpop.eup %2864  ;;  %vm3342_vm10 = vmand %vm457_vm5, %vm475_vm6  ;;  %v239_v5 = vmul.f32 %v234_v56, %v219_v28  ;;  %v306_v28 = vld [vmem:[#allocation3 + $0x98] sm:$0xff] }
 0x15f   : > { %v2867_v63 = vpop.eup %2866  ;;  %v578_v3 = vmul.f32 %v2865_v62, %v3169_v25  ;;  %v4223_v25 = vmov 0  ;;  %2483 = vmatpush3.msk.msra.mxu1 %vm3342_vm10, %v4159_v39  ;;  %v216_v62 = vld [vmem:[#allocation3 + $0x20] sm:$0xff] }
 0x160   : > { %v579_v4 = vmul.f32 %v2867_v63, %v3163_v22  ;;  %v4221_v22 = vmov 0  ;;  %v3339_v24 = vpop.permute.xlu1 %225  ;;  %v4224_v25 = vsel %vm3342_vm10, 4294967295, %v4223_v25  ;;  %2484 = vmatprep.subr.mxu1 %v4157_v53  ;;  %vm469_vm10 = vcmp.lt.s32.totalorder %v434_v35, %v3226_v50  ;;  %v187_v63 = vld [vmem:[#allocation3] sm:$0xff] }
 0x161   : > { %2461 = vmatmul.mubr.msk.f32.vlgmr.msra.gmra.mxu0 %vm4142_vm0, %v578_v3  ;;  %v4222_v22 = vsel %vm3329_vm2, 4294967295, %v4221_v22  ;;  %2485 = vmatpush3.msk.msra.mxu1 %vm3353_vm1, %v4159_v39  ;;  %vm451_vm1 = vcmp.ge.s32.totalorder %v434_v35, %v3224_v49  ;;  %vm4170_vm2 = vmmov 0   ;;  %v188_v3 = vld [vmem:[#allocation3 + $0x8] sm:$0xff]  ;;  %v211_v8 = vmul.f32 %v194_v51, %v187_v63 }
 0x162   : > { %v2869_v6 = vpop.eup %2868  ;;  %2463 = vmatprep.mubr.msk.f32.mxu0 %vm4142_vm0, %v579_v4  ;;  %2502 = vmatpush3.msk.msra.mxu0 %vm3196_vm3, %v4159_v39  ;;  %vm3377_vm3 = vmand %vm454_vm11, %vm472_vm14  ;;  %vm452_vm11 = vcmp.ge.s32.totalorder %v435_v34, %v3224_v49  ;;  %vm470_vm14 = vcmp.lt.s32.totalorder %v435_v34, %v3226_v50  ;;  %v284_v58 = vpop.permute.xlu0 %283  ;;  %v217_v4 = vld [vmem:[#allocation3 + $0x28] sm:$0xff]  ;;  %v212_v19 = vmul.f32 %v3270_v10, %v188_v3 }
 0x163   : > { %v580_v7 = vmul.f32 %v2869_v6, %v3171_v26  ;;  %2506 = vmatprep.subr.msk.mxu0 %vm3235_vm8, %v4159_v39  ;;  %v438_v26 = vadd.s32 40, %v3182_v30  ;;  %2486 = vmatprep.subr.mxu1 %v4157_v53  ;;  %v4230_v33 = vsel %vm3377_vm3, 4294967295, %v4229_v33  ;;  %vm3411_vm13 = vmand %vm451_vm1, %vm469_vm10  ;;  %v237_v21 = vmul.f32 %v3339_v24, %v217_v4 }
 0x164   : > { %2498 = vmatprep.mubr.msk.f32.mxu1 %vm4170_vm2, %v4157_v53  ;;  %v4236_v40 = vsel %vm3411_vm13, 4294967295, %v4235_v40  ;;  %vm4242_vm10 = vnez %v4220_v20  ;;  %vm4243_vm1 = vnez %v4222_v22 }
 0x165   : > { %2464 = vmatmul.mubr.msk.f32.gmra.mxu0 %vm4142_vm0, %v580_v7  ;;  %vm455_vm5 = vcmp.ge.s32.totalorder %v438_v26, %v3224_v49  ;;  %vm473_vm6 = vcmp.lt.s32.totalorder %v438_v26, %v3226_v50  ;;  %v3374_v32 = vpop.permute.xlu1 %203  ;;  %v236_v7 = vmul.f32 %v3304_v17, %v216_v62  ;;  %v190_v26 = vld [vmem:[#allocation3 + $0x18] sm:$0xff]  ;;  %v274_v17 = vld [vmem:[#allocation3 + $0x60] sm:$0xff]  ;;  %v241_v62 = vadd.f32 %v237_v21, %v212_v19  ;;  %v305_v19 = vld [vmem:[#allocation3 + $0x90] sm:$0xff] }
 0x166   : > { %vm3364_vm0 = vmand %vm455_vm5, %vm473_vm6  ;;  %vm453_vm5 = vcmp.ge.s32.totalorder %v436_v31, %v3224_v49  ;;  %vm471_vm6 = vcmp.lt.s32.totalorder %v436_v31, %v3226_v50  ;;  %2503 = vmatprep.mubr.msk.f32.mxu0 %vm4170_vm2, %v4157_v53  ;;  %v213_v31 = vmul.f32 %v3374_v32, %v189_v9  ;;  %v277_v9 = vld [vmem:[#allocation3 + $0x78] sm:$0xff]  ;;  %v332_v21 = vld [vmem:[#allocation3 + $0xa0] sm:$0xff] }
 0x167   : > { %v4228_v29 = vsel %vm3364_vm0, 4294967295, %v4227_v29  ;;  %2487 = vmatpush3.msk.msra.mxu1 %vm3364_vm0, %v4159_v39  ;;  %vm3389_vm0 = vmand %vm453_vm5, %vm471_vm6  ;;  %vm450_vm5 = vcmp.ge.s32.totalorder %v3182_v30, %v3224_v49  ;;  %vm468_vm6 = vcmp.lt.s32.totalorder %v3182_v30, %v3226_v50  ;;  %v309_v60 = vpop.permute.xlu0 %308 }
 0x168   : > { %2488 = vmatprep.subr.mxu1 %v4157_v53  ;;  %v4232_v36 = vsel %vm3389_vm0, 4294967295, %v4231_v36 }
 0x169   : > { %2489 = vmatpush3.msk.msra.mxu1 %vm3377_vm3, %v4159_v39  ;;  %vm3399_vm3 = vmand %vm452_vm11, %vm470_vm14  ;;  %vm4244_vm14 = vnez %v4224_v25 }
 0x16a   : > { %2490 = vmatprep.subr.mxu1 %v4157_v53  ;;  %v4234_v38 = vsel %vm3399_vm3, 4294967295, %v4233_v38  ;;  %v230_v41 = vpop.permute.xlu1 %229  ;;  %vm3421_vm11 = vmand %vm450_vm5, %vm468_vm6  ;;  %vm4245_vm5 = vnez %v4226_v27  ;;  %vm4246_vm6 = vnez %v4228_v29 }
 0x16b   : > { %2491 = vmatpush3.msk.msra.mxu1 %vm3389_vm0, %v4159_v39  ;;  %v4238_v42 = vsel %vm3421_vm11, 4294967295, %v4237_v42  ;;  %v317_v6 = vpop.permute.xlu0 %316  ;;  %v238_v34 = vmul.f32 %v230_v41, %v218_v12 }
 0x16c   : > { %2492 = vmatprep.subr.mxu1 %v4157_v53  ;;  %4239 = vst [vmem:[#allocation15_spill] sm:$0xff] %v4238_v42  ;;  %v303_v42 = vld [vmem:[#allocation3 + $0x80] sm:$0xff] }
 0x16d   : > { %2493 = vmatpush3.msk.msra.mxu1 %vm3399_vm3, %v4159_v39  ;;  %v242_v3 = vadd.f32 %v238_v34, %v213_v31  ;;  %v323_v56 = vmul.f32 %v309_v60, %v303_v42  ;;  %v362_v60 = vld [vmem:[#allocation3 + $0xc8] sm:$0xff]  ;;  %v335_v34 = vld [vmem:[#allocation3 + $0xb8] sm:$0xff] }
 0x16e   : > { %2494 = vmatprep.subr.mxu1 %v4157_v53 }
 0x16f   : > { %2495 = vmatpush3.msk.msra.mxu1 %vm3411_vm13, %v4159_v39  ;;  %v251_v43 = vpop.permute.xlu1 %250 }
 0x170   : > { %2496 = vmatprep.subr.mxu1 %v4157_v53  ;;  %v265_v35 = vmul.f32 %v251_v43, %v245_v14  ;;  %v342_v51 = vpop.permute.xlu0 %341 }
 0x171   : > { %2497 = vmatpush3.msk.msra.mxu1 %vm3421_vm11, %v4159_v39  ;;  %v247_v39 = vld [vmem:[#allocation3 + $0x50] sm:$0xff] }
 0x172   : > { %2552 = vmatprep.subr.mxu1 %v4157_v53  ;;  %v240_v53 = vadd.f32 %v236_v7, %v211_v8  ;;  %v295_v7 = vmul.f32 %v284_v58, %v275_v2  ;;  %v304_v8 = vld [vmem:[#allocation3 + $0x88] sm:$0xff] }
 0x173   : > { %v255_v44 = vpop.permute.xlu1 %254 }
 0x174   : > { %v266_v63 = vmul.f32 %v255_v44, %v246_v23  ;;  %v269_v30 = vadd.f32 %v265_v35, %v240_v53 }
 0x175   : > { %v367_v12 = vpop.permute.xlu0 %366 }
 0x176   : > { %v270_v32 = vadd.f32 %v266_v63, %v241_v62  ;;  %v363_v63 = vld [vmem:[#allocation3 + $0xd0] sm:$0xff] }
 0x178   : > { %v209_v45 = vpop.permute.xlu1 %208 }
 0x179   : > { %v214_v1 = vmul.f32 %v209_v45, %v190_v26  ;;  %v299_v26 = vadd.f32 %v295_v7, %v270_v32  ;;  %v375_v58 = vpop.permute.xlu0 %374  ;;  %v391_v32 = vld [vmem:[#allocation3 + $0xe8] sm:$0xff] }
 0x17a   : > { %v383_v7 = vmul.f32 %v375_v58, %v363_v63  ;;  %v4248_v63 = vld [vmem:[#allocation15_spill] sm:$0xff] }
 0x17b   : > { %v243_v43 = vadd.f32 %v239_v5, %v214_v1  ;;  %v325_v1 = vmul.f32 %v317_v6, %v305_v19  ;;  %v361_v5 = vld [vmem:[#allocation3 + $0xc0] sm:$0xff] }
 0x17c   : > { %v390_v6 = vld [vmem:[#allocation3 + $0xe0] sm:$0xff] }
 0x17d   : > { %v259_v46 = vpop.permute.xlu1 %258 }
 0x17e   : > { %v267_v24 = vmul.f32 %v259_v46, %v247_v39 }
 0x180   : > { %v271_v14 = vadd.f32 %v267_v24, %v242_v3 }
 0x182   : > { %v280_v47 = vpop.permute.xlu1 %279 }
 0x183   : > { %v294_v4 = vmul.f32 %v280_v47, %v274_v17  ;;  %v333_v47 = vld [vmem:[#allocation3 + $0xa8] sm:$0xff]  ;;  %v381_v17 = vmul.f32 %v367_v12, %v361_v5 }
 0x184   : > { %v353_v42 = vmul.f32 %v342_v51, %v333_v47  ;;  %v364_v51 = vld [vmem:[#allocation3 + $0xd8] sm:$0xff] }
 0x185   : > { %v298_v45 = vadd.f32 %v294_v4, %v269_v30 }
 0x187   : > { %v263_v48 = vpop.permute.xlu1 %262 }
 0x188   : > { %v268_v41 = vmul.f32 %v263_v48, %v248_v0  ;;  %v327_v0 = vadd.f32 %v323_v56, %v298_v45  ;;  %v334_v48 = vld [vmem:[#allocation3 + $0xb0] sm:$0xff]  ;;  %v393_v56 = vld [vmem:[#allocation3 + $0xf8] sm:$0xff] }
 0x18a   : > { %v272_v46 = vadd.f32 %v268_v41, %v243_v43  ;;  %v400_v41 = vpop.permute.xlu0 %399 }
 0x18b   : > { %v411_v12 = vmul.f32 %v400_v41, %v391_v32 }
 0x18c   : > { %v288_v49 = vpop.permute.xlu1 %287 }
 0x18d   : > { %v296_v44 = vmul.f32 %v288_v49, %v276_v37 }
 0x18e   : > { %v408_v19 = vpop.permute.xlu0 %407 }
 0x18f   : > { %v300_v31 = vadd.f32 %v296_v44, %v271_v14  ;;  %v413_v47 = vmul.f32 %v408_v19, %v393_v56 }
 0x191   : > { %v313_v50 = vpop.permute.xlu1 %312  ;;  %v329_v35 = vadd.f32 %v325_v1, %v300_v31 }
 0x192   : > { %v324_v39 = vmul.f32 %v313_v50, %v304_v8 }
 0x194   : > { %v328_v37 = vadd.f32 %v324_v39, %v299_v26 }
 0x196   : > { %v292_v52 = vpop.permute.xlu1 %291  ;;  %v357_v3 = vadd.f32 %v353_v42, %v328_v37 }
 0x197   : > { %v297_v53 = vmul.f32 %v292_v52, %v277_v9  ;;  %v392_v9 = vld [vmem:[#allocation3 + $0xf0] sm:$0xff] }
 0x199   : > { %v301_v30 = vadd.f32 %v297_v53, %v272_v46 }
 0x19b   : > { %v3433_v57 = vpop.permute.xlu1 %337 }
 0x19c   : > { %v352_v2 = vmul.f32 %v3433_v57, %v332_v21 }
 0x19e   : > { %v356_v52 = vadd.f32 %v352_v2, %v327_v0 }
 0x1a0   : > { %v3435_v59 = vpop.permute.xlu1 %320  ;;  %v385_v43 = vadd.f32 %v381_v17, %v356_v52  ;;  %v4240_v17 = vmov 1.0  }
 0x1a1   : > { %v326_v49 = vmul.f32 %v3435_v59, %v306_v28 }
 0x1a3   : > { %v330_v57 = vadd.f32 %v326_v49, %v301_v30 }
 0x1a5   : > { %v3437_v61 = vpop.permute.xlu1 %345 }
 0x1a6   : > { %v354_v62 = vmul.f32 %v3437_v61, %v334_v48 }
 0x1a8   : > { %v358_v59 = vadd.f32 %v354_v62, %v329_v35  ;;  %v4241_v62 = vmov 0.0  }
 0x1aa   : > { %v3440_v16 = vpop.permute.xlu1 %370  ;;  %v387_v26 = vadd.f32 %v383_v7, %v358_v59  ;;  %v4254_v59 = vld [vmem:[#allocation13_spill] sm:$0xff] }
 0x1ab   : > { %v382_v24 = vmul.f32 %v3440_v16, %v362_v60  ;;  %v3631_v7 = vsub.s32 0, %v4254_v59 }
 0x1ad   : > { %v386_v44 = vadd.f32 %v382_v24, %v357_v3 }
 0x1af   : > { %v350_v10 = vpop.permute.xlu1 %349  ;;  %v3451_v46 = vadd.f32 %v411_v12, %v386_v44 }
 0x1b0   : > { %v355_v4 = vmul.f32 %v350_v10, %v335_v34 }
 0x1b2   : > { %v359_v45 = vadd.f32 %v355_v4, %v330_v57 }
 0x1b4   : > { %v396_v23 = vpop.permute.xlu1 %395 }
 0x1b5   : > { %v410_v8 = vmul.f32 %v396_v23, %v390_v6  ;;  %v4249_v6 = vld [vmem:[#allocation14_spill] sm:$0xff] }
 0x1b7   : > { %v3449_v39 = vadd.f32 %v410_v8, %v385_v43 }
 0x1b9   : > { %v379_v50 = vpop.permute.xlu1 %378 }
 0x1ba   : > { %v384_v61 = vmul.f32 %v379_v50, %v364_v51 }
 0x1bc   : > { %v388_v53 = vadd.f32 %v384_v61, %v359_v45 }
 0x1be   : > { %v404_v14 = vpop.permute.xlu1 %403  ;;  %v3457_v2 = vadd.f32 %v413_v47, %v388_v53 }
 0x1bf   : > { %v412_v16 = vmul.f32 %v404_v14, %v392_v9 }
 0x1c1   : > { %v3454_v31 = vadd.f32 %v412_v16, %v387_v26 }
 0x221   : > { %v2462_v21 = vpop.f32.mrf.mxu0 }
 0x222   : > { %v683_v0 = vmul.f32 %v2462_v21, %v3451_v46  ;;  %v4255_v21 = vld [vmem:[#allocation11_spill] sm:$0xff] }
 0x223   : > { %v659_v10 = vpop.f32.mrf.mxu0 }
 0x224   : > { %v682_v23 = vmul.f32 %v659_v10, %v3449_v39  ;;  %v4256_v10 = vld [vmem:[#allocation9_spill] sm:$0xff] }
 0x225   : > { %v2465_v28 = vpop.f32.mrf.mxu0 }
 0x226   : > { %v686_v5 = vadd.f32 %v683_v0, %v682_v23  ;;  %v685_v58 = vmul.f32 %v2465_v28, %v3457_v2  ;;  %v4258_v28 = vld [vmem:[#allocation12_spill] sm:$0xff] }
 0x227   : > { %v669_v1 = vpop.f32.mrf.mxu0 }
 0x228   : > { %v684_v48 = vmul.f32 %v669_v1, %v3454_v31 }
 0x22a   : > { %v687_v37 = vadd.f32 %v686_v5, %v684_v48  ;;  %v4260_v48 = vld [vmem:[#allocation10_spill] sm:$0xff] }
 0x22c   : > { %v688_v30 = vadd.f32 %v687_v37, %v685_v58 }
 0x22e   : > { %v689_v42 = vrot.slane %v688_v30, 4 }
 0x230   : > { %v690_v49 = vadd.f32 %v689_v42, %v688_v30 }
 0x232   : > { %v691_v60 = vrot.slane %v690_v49, 2 }
 0x234   : > { %v692_v34 = vadd.f32 %v691_v60, %v690_v49 }
 0x236   : > { %v693_v50 = vrot.slane %v692_v34, 1 }
 0x238   : > { %v3461_v35 = vadd.f32 %v693_v50, %v692_v34 }
 0x23a   : > { %v695_v52 = vmul.f32 %v3461_v35, %v3461_v35 }
 0x23c   : > { %2499 = vmatmul.mubr.f32.vlgmr.msra.gmra.mxu1 %v695_v52 }
 0x23d   : > { %2553 = vmatpush3.msk.msra.mxu1 %vm3235_vm8, %v4240_v17  ;;  %2584 = vmatprep.mubr.msk.f32.mxu1 %vm4170_vm2, %v4241_v62  ;;  %vm4247_vm2 = vnez %v4230_v33 }
 0x23e   : > { %2554 = vmatprep.subr.mxu1 %v4241_v62 }
 0x23f   : > { %2555 = vmatpush3.msk.msra.mxu1 %vm3243_vm9, %v4240_v17 }
 0x240   : > { %2556 = vmatprep.subr.mxu1 %v4241_v62 }
 0x241   : > { %2557 = vmatpush3.msk.msra.mxu1 %vm3272_vm12, %v4240_v17 }
 0x242   : > { %2558 = vmatprep.subr.mxu1 %v4241_v62 }
 0x243   : > { %2559 = vmatpush3.msk.msra.mxu1 %vm3283_vm15, %v4240_v17 }
 0x244   : > { %2560 = vmatprep.subr.mxu1 %v4241_v62 }
 0x245   : > { %2561 = vmatpush3.msk.msra.mxu1 %vm3294_vm4, %v4240_v17 }
 0x246   : > { %2562 = vmatprep.subr.mxu1 %v4241_v62 }
 0x247   : > { %2563 = vmatpush3.msk.msra.mxu1 %vm3307_vm7, %v4240_v17 }
 0x248   : > { %2564 = vmatprep.subr.mxu1 %v4241_v62 }
 0x249   : > { %2565 = vmatpush3.msk.msra.mxu1 %vm4242_vm10, %v4240_v17 }
 0x24a   : > { %2566 = vmatprep.subr.mxu1 %v4241_v62 }
 0x24b   : > { %2567 = vmatpush3.msk.msra.mxu1 %vm4243_vm1, %v4240_v17 }
 0x24c   : > { %2568 = vmatprep.subr.mxu1 %v4241_v62 }
 0x24d   : > { %2569 = vmatpush3.msk.msra.mxu1 %vm4244_vm14, %v4240_v17 }
 0x24e   : > { %2570 = vmatprep.subr.mxu1 %v4241_v62 }
 0x24f   : > { %2571 = vmatpush3.msk.msra.mxu1 %vm4245_vm5, %v4240_v17 }
 0x250   : > { %2572 = vmatprep.subr.mxu1 %v4241_v62 }
 0x251   : > { %2573 = vmatpush3.msk.msra.mxu1 %vm4246_vm6, %v4240_v17 }
 0x252   : > { %2574 = vmatprep.subr.mxu1 %v4241_v62 }
 0x253   : > { %2575 = vmatpush3.msk.msra.mxu1 %vm4247_vm2, %v4240_v17 }
 0x254   : > { %2576 = vmatprep.subr.mxu1 %v4241_v62 }
 0x255   : > { %2577 = vmatpush3.msk.msra.mxu1 %vm3389_vm0, %v4240_v17  ;;  %vm4250_vm0 = vnez %v4249_v6 }
 0x256   : > { %2578 = vmatprep.subr.mxu1 %v4241_v62 }
 0x257   : > { %2579 = vmatpush3.msk.msra.mxu1 %vm3399_vm3, %v4240_v17 }
 0x258   : > { %2580 = vmatprep.subr.mxu1 %v4241_v62 }
 0x259   : > { %2581 = vmatpush3.msk.msra.mxu1 %vm3411_vm13, %v4240_v17  ;;  %vm4251_vm13 = vcmask 64512  }
 0x25a   : > { %2582 = vmatprep.subr.mxu1 %v4241_v62 }
 0x25b   : > { %2583 = vmatpush3.msk.msra.mxu1 %vm3421_vm11, %v4240_v17 }
 0x25c   : > { %2630 = vmatprep.subr.msk.mxu1 %vm4250_vm0, %v4240_v17 }
 0x2fc   : > { %v762_v3 = vpop.f32.mrf.mxu1 }
 0x2fd   : > { %v766_v57 = vadd.f32 1.0, %v762_v3  ;;  %v769_v24 = vadd.f32 1e-12, %v762_v3 }
 0x2fe   : > { %v2500_v4 = vpop.f32.mrf.mxu1 }
 0x2ff   : > { %2870 = vrcp.f32 %v766_v57 }
 0x300   : > { %2872 = vrsqrt.f32 %v769_v24 }
 0x30c   : > { %v2871_v32 = vpop.eup %2870 }
 0x30d   : > { %v768_v41 = vmul.f32 %v2871_v32, %v762_v3  ;;  %v2873_v51 = vpop.eup %2872 }
 0x30f   : > { %v771_v43 = vmul.f32 %v2873_v51, %v768_v41 }
 0x311   : > { %2504 = vmatmul.mubr.msk.f32.vlgmr.msra.gmra.mxu0 %vm4251_vm13, %v771_v43  ;;  %vm4252_vm13 = vnez %v4232_v36 }
 0x312   : > { %2507 = vmatpush3.msk.msra.mxu0 %vm3235_vm8, %v4240_v17 }
 0x313   : > { %2508 = vmatprep.subr.msk.mxu0 %vm3243_vm9, %v4240_v17 }
 0x314   : > { %2509 = vmatpush3.msk.msra.mxu0 %vm3243_vm9, %v4240_v17 }
 0x315   : > { %2510 = vmatprep.subr.msk.mxu0 %vm3272_vm12, %v4240_v17 }
 0x316   : > { %2511 = vmatpush3.msk.msra.mxu0 %vm3272_vm12, %v4240_v17 }
 0x317   : > { %2512 = vmatprep.subr.msk.mxu0 %vm3283_vm15, %v4240_v17 }
 0x318   : > { %2513 = vmatpush3.msk.msra.mxu0 %vm3283_vm15, %v4240_v17 }
 0x319   : > { %2514 = vmatprep.subr.msk.mxu0 %vm3294_vm4, %v4240_v17 }
 0x31a   : > { %2515 = vmatpush3.msk.msra.mxu0 %vm3294_vm4, %v4240_v17 }
 0x31b   : > { %2516 = vmatprep.subr.msk.mxu0 %vm3307_vm7, %v4240_v17 }
 0x31c   : > { %2517 = vmatpush3.msk.msra.mxu0 %vm3307_vm7, %v4240_v17 }
 0x31d   : > { %2518 = vmatprep.subr.msk.mxu0 %vm4242_vm10, %v4240_v17 }
 0x31e   : > { %2519 = vmatpush3.msk.msra.mxu0 %vm4242_vm10, %v4240_v17 }
 0x31f   : > { %2520 = vmatprep.subr.msk.mxu0 %vm4243_vm1, %v4240_v17 }
 0x320   : > { %2521 = vmatpush3.msk.msra.mxu0 %vm4243_vm1, %v4240_v17 }
 0x321   : > { %2522 = vmatprep.subr.msk.mxu0 %vm4244_vm14, %v4240_v17 }
 0x322   : > { %2523 = vmatpush3.msk.msra.mxu0 %vm4244_vm14, %v4240_v17 }
 0x323   : > { %2524 = vmatprep.subr.msk.mxu0 %vm4245_vm5, %v4240_v17 }
 0x324   : > { %2525 = vmatpush3.msk.msra.mxu0 %vm4245_vm5, %v4240_v17 }
 0x325   : > { %2526 = vmatprep.subr.msk.mxu0 %vm4246_vm6, %v4240_v17 }
 0x326   : > { %2527 = vmatpush3.msk.msra.mxu0 %vm4246_vm6, %v4240_v17  ;;  %vm4253_vm6 = vnez %v4236_v40 }
 0x327   : > { %2528 = vmatprep.subr.msk.mxu0 %vm4247_vm2, %v4240_v17 }
 0x328   : > { %2529 = vmatpush3.msk.msra.mxu0 %vm4247_vm2, %v4240_v17 }
 0x329   : > { %2530 = vmatprep.subr.msk.mxu0 %vm4252_vm13, %v4240_v17 }
 0x32a   : > { %2531 = vmatpush3.msk.msra.mxu0 %vm4252_vm13, %v4240_v17 }
 0x32b   : > { %2532 = vmatprep.subr.msk.mxu0 %vm3399_vm3, %v4240_v17 }
 0x32c   : > { %2533 = vmatpush3.msk.msra.mxu0 %vm3399_vm3, %v4240_v17 }
 0x32d   : > { %2534 = vmatprep.subr.msk.mxu0 %vm4253_vm6, %v4240_v17 }
 0x32e   : > { %2535 = vmatpush3.msk.msra.mxu0 %vm4253_vm6, %v4240_v17 }
 0x32f   : > { %2536 = vmatprep.subr.msk.mxu0 %vm3421_vm11, %v4240_v17 }
 0x330   : > { %2537 = vmatpush3.msk.msra.mxu0 %vm3421_vm11, %v4240_v17  ;;  %vm4257_vm11 = vcmask 64512  }
 0x331   : > { %2544 = vmatprep.subr.msk.mxu0 %vm4250_vm0, %v4240_v17  ;;  %vm4259_vm6 = vmmov %vm4257_vm11 }
 0x332   : > { %vm4261_vm3 = vmmov %vm4259_vm6 }
 0x333   : > { %vm4262_vm13 = vmmov %vm4261_vm3 }
 0x3d1   : > { %v841_v8 = vpop.f32.mrf.mxu0 }
 0x3d2   : > { %v845_v9 = vmul.f32 %v841_v8, %v3461_v35 }
 0x3d3   : > { %v2505_v14 = vpop.f32.mrf.mxu0 }
 0x3d4   : > { %v849_v44 = vrot.slane %v845_v9, %v3631_v7 }
 0x3d6   : > { %v850_v12 = vmul.f32 %v849_v44, %v3449_v39  ;;  %v851_v45 = vmul.f32 %v849_v44, %v3451_v46  ;;  %v852_v61 = vmul.f32 %v849_v44, %v3454_v31  ;;  %v853_v56 = vmul.f32 %v849_v44, %v3457_v2 }
 0x3d8   : > { %2538 = vmatprep.mubr.f32.mxu0 %v850_v12 }
 0x3d9   : > { %2539 = vmatmul.mubr.f32.vlgmr.msra.gmra.mxu0 %v851_v45 }
 0x3da   : > { %2541 = vmatprep.mubr.f32.mxu0 %v852_v61  ;;  %2545 = vmatpush3.msk.msra.mxu0 %vm4250_vm0, %v4240_v17 }
 0x3db   : > { %2587 = vmatprep.subr.mxu0 %v4241_v62 }
 0x3dd   : > { %2542 = vmatmul.mubr.f32.gmra.mxu0 %v853_v56 }
 0x499   : > { %v2540_v19 = vpop.f32.mrf.mxu0 }
 0x49a   : > { %v3644_v26 = vadd.f32 %v2540_v19, %v4255_v21 }
 0x49b   : > { %v920_v16 = vpop.f32.mrf.mxu0 }
 0x49c   : > { %v3647_v53 = vadd.f32 %v920_v16, %v4256_v10  ;;  %v946_v47 = vsel %vm4257_vm11, %v3644_v26, -inf  ;;  %vm4263_vm11 = vmmov %vm4261_vm3 }
 0x49d   : > { %947 = vmax.xlane.f32.xlu0 %v946_v47  ;;  %v2543_v23 = vpop.f32.mrf.mxu0 }
 0x49e   : > { %v3652_v0 = vadd.f32 %v2543_v23, %v4258_v28  ;;  %v943_v1 = vsel %vm4259_vm6, %v3647_v53, -inf  ;;  %vm4264_vm6 = vmmov %vm4261_vm3 }
 0x49f   : > { %944 = vmax.xlane.f32.xlu1 %v943_v1  ;;  %v930_v5 = vpop.f32.mrf.mxu0 }
 0x4a0   : > { %v3657_v58 = vadd.f32 %v930_v5, %v4260_v48  ;;  %v952_v37 = vsel %vm4261_vm3, %v3652_v0, -inf }
 0x4a2   : > { %v949_v30 = vsel %vm4262_vm13, %v3657_v58, -inf  ;;  %vm4265_vm13 = vmmov %vm4261_vm3 }
 0x4a3   : > { %953 = vmax.xlane.f32.xlu1 %v952_v37  ;;  %950 = vmax.xlane.f32.xlu0 %v949_v30 }
 0x526   : > { %v948_v42 = vpop.xlane.xlu0 %947 }
 0x527   : > { %v956_v49 = vsub.f32 %v3644_v26, %v948_v42 }
 0x528   : > { %v945_v60 = vpop.xlane.xlu1 %944 }
 0x529   : > { %v961_v34 = vmul.f32 1.442695, %v956_v49  ;;  %v955_v50 = vsub.f32 %v3647_v53, %v945_v60 }
 0x52b   : > { %2874 = vpow2.f32 %v961_v34  ;;  %v959_v35 = vmul.f32 1.442695, %v955_v50 }
 0x52c   : > { %v954_v52 = vpop.xlane.xlu1 %953  ;;  %v951_v3 = vpop.xlane.xlu0 %950 }
 0x52d   : > { %2876 = vpow2.f32 %v959_v35  ;;  %v958_v57 = vsub.f32 %v3652_v0, %v954_v52  ;;  %v957_v24 = vsub.f32 %v3657_v58, %v951_v3 }
 0x52f   : > { %v965_v4 = vmul.f32 1.442695, %v958_v57  ;;  %v963_v32 = vmul.f32 1.442695, %v957_v24 }
 0x531   : > { %2878 = vpow2.f32 %v965_v4 }
 0x532   : > { %2880 = vpow2.f32 %v963_v32 }
 0x538   : > { %v2875_v41 = vpop.eup %2874 }
 0x539   : > { %v970_v51 = vsel %vm4261_vm3, %v2875_v41, 0.0 }
 0x53a   : > { %v2877_v43 = vpop.eup %2876  ;;  %971 = vadd.xlane.f32.xlu1 %v970_v51 }
 0x53b   : > { %v967_v59 = vsel %vm4263_vm11, %v2877_v43, 0.0  ;;  %vm4266_vm11 = vmmov %vm4261_vm3 }
 0x53c   : > { %968 = vadd.xlane.f32.xlu0 %v967_v59 }
 0x53e   : > { %v2879_v8 = vpop.eup %2878 }
 0x53f   : > { %v2881_v9 = vpop.eup %2880  ;;  %v976_v14 = vsel %vm4264_vm6, %v2879_v8, 0.0  ;;  %vm4267_vm6 = vmmov %vm4261_vm3 }
 0x540   : > { %977 = vadd.xlane.f32.xlu1 %v976_v14  ;;  %v973_v44 = vsel %vm4265_vm13, %v2881_v9, 0.0  ;;  %vm4268_vm13 = vmmov %vm4261_vm3 }
 0x541   : > { %974 = vadd.xlane.f32.xlu0 %v973_v44 }
 0x5c3   : > { %v972_v12 = vpop.xlane.xlu1 %971 }
 0x5c4   : > { %2882 = vrcp.f32 %v972_v12 }
 0x5c5   : > { %v969_v45 = vpop.xlane.xlu0 %968 }
 0x5c6   : > { %2884 = vrcp.f32 %v969_v45 }
 0x5c9   : > { %v978_v61 = vpop.xlane.xlu1 %977 }
 0x5ca   : > { %2886 = vrcp.f32 %v978_v61  ;;  %v975_v56 = vpop.xlane.xlu0 %974 }
 0x5cb   : > { %2888 = vrcp.f32 %v975_v56 }
 0x5d1   : > { %v2883_v19 = vpop.eup %2882 }
 0x5d2   : > { %v984_v10 = vmul.f32 %v2883_v19, %v2875_v41 }
 0x5d3   : > { %v2885_v21 = vpop.eup %2884 }
 0x5d4   : > { %v983_v16 = vmul.f32 %v2885_v21, %v2877_v43 }
 0x5d6   : > { %2546 = vmatprep.mubr.msk.f32.mxu0 %vm4261_vm3, %v983_v16  ;;  %vm4269_vm3 = vmmov 0  }
 0x5d7   : > { %v2887_v47 = vpop.eup %2886  ;;  %2547 = vmatmul.mubr.msk.f32.vlgmr.msra.gmra.mxu0 %vm4266_vm11, %v984_v10  ;;  %vm4270_vm11 = vmmov %vm4267_vm6 }
 0x5d8   : > { %v2889_v23 = vpop.eup %2888  ;;  %v986_v28 = vmul.f32 %v2887_v47, %v2879_v8  ;;  %2588 = vmatpush3.msk.msra.mxu0 %vm4250_vm0, %v4240_v17 }
 0x5d9   : > { %v985_v1 = vmul.f32 %v2889_v23, %v2881_v9  ;;  %2592 = vmatprep.subr.msk.mxu0 %vm3235_vm8, %v4240_v17 }
 0x5db   : > { %2549 = vmatprep.mubr.msk.f32.mxu0 %vm4267_vm6, %v985_v1  ;;  %vm4271_vm6 = vnez %v4228_v29 }
 0x5dc   : > { %2550 = vmatmul.mubr.msk.f32.gmra.mxu0 %vm4268_vm13, %v986_v28  ;;  %vm4272_vm13 = vnez %v4232_v36 }
 0x5dd   : > { %2589 = vmatprep.mubr.msk.f32.mxu0 %vm4269_vm3, %v4241_v62 }
 0x697   : > { %v2548_v5 = vpop.f32.mrf.mxu0 }
 0x698   : > { %v1085_v42 = vmul.f32 %v2548_v5, %v3451_v46 }
 0x699   : > { %v1065_v48 = vpop.f32.mrf.mxu0 }
 0x69a   : > { %v1084_v37 = vmul.f32 %v1065_v48, %v3449_v39 }
 0x69c   : > { %v2551_v30 = vpop.f32.mrf.mxu0  ;;  %v1088_v60 = vadd.f32 %v1085_v42, %v1084_v37 }
 0x69d   : > { %v1087_v50 = vmul.f32 %v2551_v30, %v3457_v2 }
 0x69e   : > { %v1075_v49 = vpop.f32.mrf.mxu0 }
 0x69f   : > { %v1086_v34 = vmul.f32 %v1075_v49, %v3454_v31 }
 0x6a1   : > { %v1089_v35 = vadd.f32 %v1088_v60, %v1086_v34 }
 0x6a3   : > { %v1090_v52 = vadd.f32 %v1089_v35, %v1087_v50 }
 0x6a5   : > { %v1091_v3 = vrot.slane %v1090_v52, 4 }
 0x6a7   : > { %v1092_v57 = vadd.f32 %v1091_v3, %v1090_v52 }
 0x6a9   : > { %v1093_v24 = vrot.slane %v1092_v57, 2 }
 0x6ab   : > { %v1094_v4 = vadd.f32 %v1093_v24, %v1092_v57 }
 0x6ad   : > { %v1095_v32 = vrot.slane %v1094_v4, 1 }
 0x6af   : > { %v1096_v41 = vadd.f32 %v1095_v32, %v1094_v4 }
 0x6b1   : > { %v1097_v51 = vmul.f32 %v1096_v41, %v1096_v41 }
 0x6b3   : > { %2585 = vmatmul.mubr.f32.vlgmr.msra.gmra.mxu1 %v1097_v51 }
 0x6b4   : > { %2631 = vmatpush3.msk.msra.mxu1 %vm4250_vm0, %v4240_v17 }
 0x6b5   : > { %2638 = vmatprep.subr.mxu1 %v4241_v62 }
 0x773   : > { %v1164_v43 = vpop.f32.mrf.mxu1 }
 0x774   : > { %v1168_v59 = vadd.f32 1.0, %v1164_v43  ;;  %v1171_v8 = vadd.f32 1e-12, %v1164_v43 }
 0x775   : > { %v2586_v9 = vpop.f32.mrf.mxu1 }
 0x776   : > { %2890 = vrcp.f32 %v1168_v59 }
 0x777   : > { %2892 = vrsqrt.f32 %v1171_v8 }
 0x783   : > { %v2891_v14 = vpop.eup %2890 }
 0x784   : > { %v1170_v44 = vmul.f32 %v2891_v14, %v1164_v43  ;;  %v2893_v12 = vpop.eup %2892 }
 0x786   : > { %v1173_v45 = vmul.f32 %v2893_v12, %v1170_v44 }
 0x788   : > { %2590 = vmatmul.mubr.msk.f32.vlgmr.msra.gmra.mxu0 %vm4270_vm11, %v1173_v45  ;;  %vm4273_vm11 = vnez %v4234_v38 }
 0x789   : > { %2593 = vmatpush3.msk.msra.mxu0 %vm3235_vm8, %v4240_v17 }
 0x78a   : > { %2594 = vmatprep.subr.msk.mxu0 %vm3243_vm9, %v4240_v17 }
 0x78b   : > { %2595 = vmatpush3.msk.msra.mxu0 %vm3243_vm9, %v4240_v17 }
 0x78c   : > { %2596 = vmatprep.subr.msk.mxu0 %vm3272_vm12, %v4240_v17 }
 0x78d   : > { %2597 = vmatpush3.msk.msra.mxu0 %vm3272_vm12, %v4240_v17 }
 0x78e   : > { %2598 = vmatprep.subr.msk.mxu0 %vm3283_vm15, %v4240_v17 }
 0x78f   : > { %2599 = vmatpush3.msk.msra.mxu0 %vm3283_vm15, %v4240_v17 }
 0x790   : > { %2600 = vmatprep.subr.msk.mxu0 %vm3294_vm4, %v4240_v17 }
 0x791   : > { %2601 = vmatpush3.msk.msra.mxu0 %vm3294_vm4, %v4240_v17 }
 0x792   : > { %2602 = vmatprep.subr.msk.mxu0 %vm3307_vm7, %v4240_v17 }
 0x793   : > { %2603 = vmatpush3.msk.msra.mxu0 %vm3307_vm7, %v4240_v17 }
 0x794   : > { %2604 = vmatprep.subr.msk.mxu0 %vm4242_vm10, %v4240_v17 }
 0x795   : > { %2605 = vmatpush3.msk.msra.mxu0 %vm4242_vm10, %v4240_v17 }
 0x796   : > { %2606 = vmatprep.subr.msk.mxu0 %vm4243_vm1, %v4240_v17 }
 0x797   : > { %2607 = vmatpush3.msk.msra.mxu0 %vm4243_vm1, %v4240_v17 }
 0x798   : > { %2608 = vmatprep.subr.msk.mxu0 %vm4244_vm14, %v4240_v17 }
 0x799   : > { %2609 = vmatpush3.msk.msra.mxu0 %vm4244_vm14, %v4240_v17 }
 0x79a   : > { %2610 = vmatprep.subr.msk.mxu0 %vm4245_vm5, %v4240_v17 }
 0x79b   : > { %2611 = vmatpush3.msk.msra.mxu0 %vm4245_vm5, %v4240_v17 }
 0x79c   : > { %2612 = vmatprep.subr.msk.mxu0 %vm4271_vm6, %v4240_v17 }
 0x79d   : > { %2613 = vmatpush3.msk.msra.mxu0 %vm4271_vm6, %v4240_v17  ;;  %vm4274_vm6 = vnez %v4236_v40 }
 0x79e   : > { %2614 = vmatprep.subr.msk.mxu0 %vm4247_vm2, %v4240_v17 }
 0x79f   : > { %2615 = vmatpush3.msk.msra.mxu0 %vm4247_vm2, %v4240_v17  ;;  %vm4275_vm2 = vnez %v4248_v63 }
 0x7a0   : > { %2616 = vmatprep.subr.msk.mxu0 %vm4272_vm13, %v4240_v17 }
 0x7a1   : > { %2617 = vmatpush3.msk.msra.mxu0 %vm4272_vm13, %v4240_v17 }
 0x7a2   : > { %2618 = vmatprep.subr.msk.mxu0 %vm4273_vm11, %v4240_v17 }
 0x7a3   : > { %2619 = vmatpush3.msk.msra.mxu0 %vm4273_vm11, %v4240_v17 }
 0x7a4   : > { %2620 = vmatprep.subr.msk.mxu0 %vm4274_vm6, %v4240_v17 }
 0x7a5   : > { %2621 = vmatpush3.msk.msra.mxu0 %vm4274_vm6, %v4240_v17 }
 0x7a6   : > { %2622 = vmatprep.subr.msk.mxu0 %vm4275_vm2, %v4240_v17 }
 0x7a7   : > { %2623 = vmatpush3.msk.msra.mxu0 %vm4275_vm2, %v4240_v17 }
 0x7a8   : > { %2673 = vmatprep.subr.mxu0 %v4241_v62 }
 0x848   : > { %v1243_v61 = vpop.f32.mrf.mxu0 }
 0x849   : > { %v1247_v56 = vmul.f32 %v1243_v61, %v1096_v41 }
 0x84a   : > { %v2591_v19 = vpop.f32.mrf.mxu0 }
 0x84b   : > { %v1251_v21 = vrot.slane %v1247_v56, %v3631_v7 }
 0x84d   : > { %v1252_v16 = vmul.f32 %v1251_v21, %v3449_v39  ;;  %v1253_v10 = vmul.f32 %v1251_v21, %v3451_v46  ;;  %v1254_v47 = vmul.f32 %v1251_v21, %v3454_v31  ;;  %v1255_v23 = vmul.f32 %v1251_v21, %v3457_v2 }
 0x84f   : > { %2624 = vmatprep.mubr.f32.mxu0 %v1252_v16 }
 0x850   : > { %2625 = vmatmul.mubr.f32.vlgmr.msra.gmra.mxu0 %v1253_v10 }
 0x851   : > { %2627 = vmatprep.mubr.f32.mxu0 %v1254_v47  ;;  %2674 = vmatpush3.msk.msra.mxu0 %vm4250_vm0, %v4240_v17  ;;  %vm4276_vm0 = vcmask 64512  }
 0x852   : > { %2678 = vmatprep.subr.msk.mxu0 %vm3235_vm8, %v4240_v17  ;;  %vm4277_vm2 = vmmov %vm4276_vm0 }
 0x853   : > { %vm4278_vm6 = vmmov %vm4276_vm0 }
 0x854   : > { %2628 = vmatmul.mubr.f32.gmra.mxu0 %v1255_v23  ;;  %vm4279_vm11 = vmmov %vm4276_vm0 }
 0x855   : > { %2675 = vmatprep.mubr.msk.f32.mxu0 %vm4269_vm3, %v4241_v62 }
 0x910   : > { %v2626_v28 = vpop.f32.mrf.mxu0 }
 0x911   : > { %v3800_v1 = vadd.f32 %v2626_v28, %v3644_v26 }
 0x912   : > { %v1322_v5 = vpop.f32.mrf.mxu0 }
 0x913   : > { %v3803_v48 = vadd.f32 %v1322_v5, %v3647_v53  ;;  %v1348_v37 = vsel %vm4276_vm0, %v3800_v1, -inf }
 0x914   : > { %1349 = vmax.xlane.f32.xlu1 %v1348_v37  ;;  %v2629_v30 = vpop.f32.mrf.mxu0 }
 0x915   : > { %v3808_v42 = vadd.f32 %v2629_v30, %v3652_v0  ;;  %v1345_v49 = vsel %vm4277_vm2, %v3803_v48, -inf  ;;  %vm4280_vm2 = vmmov %vm4276_vm0 }
 0x916   : > { %1346 = vmax.xlane.f32.xlu0 %v1345_v49  ;;  %v1332_v60 = vpop.f32.mrf.mxu0 }
 0x917   : > { %v3813_v26 = vadd.f32 %v1332_v60, %v3657_v58  ;;  %v1354_v53 = vsel %vm4278_vm6, %v3808_v42, -inf  ;;  %vm4281_vm6 = vmmov %vm4276_vm0 }
 0x918   : > { %1355 = vmax.xlane.f32.xlu1 %v1354_v53 }
 0x919   : > { %v1351_v34 = vsel %vm4279_vm11, %v3813_v26, -inf  ;;  %vm4282_vm11 = vmmov %vm4276_vm0 }
 0x91a   : > { %1352 = vmax.xlane.f32.xlu0 %v1351_v34 }
 0x99d   : > { %v1350_v50 = vpop.xlane.xlu1 %1349 }
 0x99e   : > { %v1358_v0 = vsub.f32 %v3800_v1, %v1350_v50 }
 0x99f   : > { %v1347_v35 = vpop.xlane.xlu0 %1346 }
 0x9a0   : > { %v1363_v52 = vmul.f32 1.442695, %v1358_v0  ;;  %v1357_v3 = vsub.f32 %v3803_v48, %v1347_v35 }
 0x9a1   : > { %v1356_v57 = vpop.xlane.xlu1 %1355 }
 0x9a2   : > { %2894 = vpow2.f32 %v1363_v52  ;;  %v1361_v24 = vmul.f32 1.442695, %v1357_v3  ;;  %v1360_v58 = vsub.f32 %v3808_v42, %v1356_v57 }
 0x9a3   : > { %v1353_v4 = vpop.xlane.xlu0 %1352 }
 0x9a4   : > { %2896 = vpow2.f32 %v1361_v24  ;;  %v1367_v32 = vmul.f32 1.442695, %v1360_v58  ;;  %v1359_v41 = vsub.f32 %v3813_v26, %v1353_v4 }
 0x9a6   : > { %2898 = vpow2.f32 %v1367_v32  ;;  %v1365_v51 = vmul.f32 1.442695, %v1359_v41 }
 0x9a8   : > { %2900 = vpow2.f32 %v1365_v51 }
 0x9af   : > { %v2895_v43 = vpop.eup %2894 }
 0x9b0   : > { %v1372_v59 = vsel %vm4276_vm0, %v2895_v43, 0.0 }
 0x9b1   : > { %v2897_v8 = vpop.eup %2896  ;;  %1373 = vadd.xlane.f32.xlu1 %v1372_v59 }
 0x9b2   : > { %v1369_v9 = vsel %vm4280_vm2, %v2897_v8, 0.0  ;;  %vm4283_vm2 = vmmov %vm4276_vm0 }
 0x9b3   : > { %v2899_v14 = vpop.eup %2898  ;;  %1370 = vadd.xlane.f32.xlu0 %v1369_v9 }
 0x9b4   : > { %v1378_v44 = vsel %vm4281_vm6, %v2899_v14, 0.0  ;;  %vm4284_vm6 = vmmov %vm4276_vm0 }
 0x9b5   : > { %v2901_v12 = vpop.eup %2900  ;;  %1379 = vadd.xlane.f32.xlu1 %v1378_v44 }
 0x9b6   : > { %v1375_v45 = vsel %vm4282_vm11, %v2901_v12, 0.0  ;;  %vm4285_vm11 = vmmov %vm4276_vm0 }
 0x9b7   : > { %1376 = vadd.xlane.f32.xlu0 %v1375_v45 }
 0xa3a   : > { %v1374_v61 = vpop.xlane.xlu1 %1373 }
 0xa3b   : > { %2902 = vrcp.f32 %v1374_v61 }
 0xa3c   : > { %v1371_v56 = vpop.xlane.xlu0 %1370 }
 0xa3d   : > { %2904 = vrcp.f32 %v1371_v56 }
 0xa3e   : > { %v1380_v19 = vpop.xlane.xlu1 %1379 }
 0xa3f   : > { %2906 = vrcp.f32 %v1380_v19 }
 0xa40   : > { %v1377_v21 = vpop.xlane.xlu0 %1376 }
 0xa41   : > { %2908 = vrcp.f32 %v1377_v21 }
 0xa48   : > { %v2903_v16 = vpop.eup %2902 }
 0xa49   : > { %v1386_v23 = vmul.f32 %v2903_v16, %v2895_v43 }
 0xa4a   : > { %v2905_v10 = vpop.eup %2904 }
 0xa4b   : > { %v1385_v47 = vmul.f32 %v2905_v10, %v2897_v8 }
 0xa4c   : > { %v2907_v28 = vpop.eup %2906 }
 0xa4d   : > { %2632 = vmatprep.mubr.msk.f32.mxu1 %vm4276_vm0, %v1385_v47  ;;  %v1388_v30 = vmul.f32 %v2907_v28, %v2899_v14  ;;  %vm4286_vm0 = vnez %v4228_v29 }
 0xa4e   : > { %v2909_v5 = vpop.eup %2908  ;;  %2633 = vmatmul.mubr.msk.f32.vlgmr.msra.gmra.mxu1 %vm4283_vm2, %v1386_v23  ;;  %vm4287_vm2 = vnez %v4230_v33 }
 0xa4f   : > { %v1387_v37 = vmul.f32 %v2909_v5, %v2901_v12  ;;  %2639 = vmatpush3.msk.msra.mxu1 %vm3235_vm8, %v4240_v17 }
 0xa50   : > { %2640 = vmatprep.subr.mxu1 %v4241_v62 }
 0xa51   : > { %2635 = vmatprep.mubr.msk.f32.mxu1 %vm4284_vm6, %v1387_v37  ;;  %2641 = vmatpush3.msk.msra.mxu1 %vm3243_vm9, %v4240_v17  ;;  %vm4288_vm6 = vnez %v4234_v38 }
 0xa52   : > { %2636 = vmatmul.mubr.msk.f32.gmra.mxu1 %vm4285_vm11, %v1388_v30  ;;  %2642 = vmatprep.subr.mxu1 %v4241_v62  ;;  %vm4289_vm11 = vnez %v4236_v40 }
 0xa53   : > { %2643 = vmatpush3.msk.msra.mxu1 %vm3272_vm12, %v4240_v17  ;;  %2670 = vmatprep.mubr.msk.f32.mxu1 %vm4269_vm3, %v4241_v62  ;;  %vm4290_vm3 = vnez %v4248_v63 }
 0xa54   : > { %2644 = vmatprep.subr.mxu1 %v4241_v62 }
 0xa55   : > { %2645 = vmatpush3.msk.msra.mxu1 %vm3283_vm15, %v4240_v17 }
 0xa56   : > { %2646 = vmatprep.subr.mxu1 %v4241_v62 }
 0xa57   : > { %2647 = vmatpush3.msk.msra.mxu1 %vm3294_vm4, %v4240_v17 }
 0xa58   : > { %2648 = vmatprep.subr.mxu1 %v4241_v62 }
 0xa59   : > { %2649 = vmatpush3.msk.msra.mxu1 %vm3307_vm7, %v4240_v17 }
 0xa5a   : > { %2650 = vmatprep.subr.mxu1 %v4241_v62 }
 0xa5b   : > { %2651 = vmatpush3.msk.msra.mxu1 %vm4242_vm10, %v4240_v17 }
 0xa5c   : > { %2652 = vmatprep.subr.mxu1 %v4241_v62 }
 0xa5d   : > { %2653 = vmatpush3.msk.msra.mxu1 %vm4243_vm1, %v4240_v17 }
 0xa5e   : > { %2654 = vmatprep.subr.mxu1 %v4241_v62 }
 0xa5f   : > { %2655 = vmatpush3.msk.msra.mxu1 %vm4244_vm14, %v4240_v17 }
 0xa60   : > { %2656 = vmatprep.subr.mxu1 %v4241_v62 }
 0xa61   : > { %2657 = vmatpush3.msk.msra.mxu1 %vm4245_vm5, %v4240_v17 }
 0xa62   : > { %2658 = vmatprep.subr.mxu1 %v4241_v62 }
 0xa63   : > { %2659 = vmatpush3.msk.msra.mxu1 %vm4286_vm0, %v4240_v17 }
 0xa64   : > { %2660 = vmatprep.subr.mxu1 %v4241_v62 }
 0xa65   : > { %2661 = vmatpush3.msk.msra.mxu1 %vm4287_vm2, %v4240_v17 }
 0xa66   : > { %2662 = vmatprep.subr.mxu1 %v4241_v62 }
 0xa67   : > { %2663 = vmatpush3.msk.msra.mxu1 %vm4272_vm13, %v4240_v17  ;;  %vm4291_vm13 = vnez %v4249_v6 }
 0xa68   : > { %2664 = vmatprep.subr.mxu1 %v4241_v62 }
 0xa69   : > { %2665 = vmatpush3.msk.msra.mxu1 %vm4288_vm6, %v4240_v17 }
 0xa6a   : > { %2666 = vmatprep.subr.mxu1 %v4241_v62 }
 0xa6b   : > { %2667 = vmatpush3.msk.msra.mxu1 %vm4289_vm11, %v4240_v17 }
 0xa6c   : > { %2668 = vmatprep.subr.mxu1 %v4241_v62 }
 0xa6d   : > { %2669 = vmatpush3.msk.msra.mxu1 %vm4290_vm3, %v4240_v17  ;;  %vm4292_vm3 = vcmask 64512  }
 0xa6e   : > { %2716 = vmatprep.subr.msk.mxu1 %vm4291_vm13, %v4240_v17 }
 0xb0e   : > { %v2634_v49 = vpop.f32.mrf.mxu1 }
 0xb0f   : > { %v1487_v50 = vmul.f32 %v2634_v49, %v3451_v46 }
 0xb10   : > { %v1467_v60 = vpop.f32.mrf.mxu1 }
 0xb11   : > { %v1486_v53 = vmul.f32 %v1467_v60, %v3449_v39 }
 0xb12   : > { %v2637_v34 = vpop.f32.mrf.mxu1 }
 0xb13   : > { %v1490_v35 = vadd.f32 %v1487_v50, %v1486_v53  ;;  %v1489_v3 = vmul.f32 %v2637_v34, %v3457_v2 }
 0xb14   : > { %v1477_v0 = vpop.f32.mrf.mxu1 }
 0xb15   : > { %v1488_v52 = vmul.f32 %v1477_v0, %v3454_v31 }
 0xb17   : > { %v1491_v57 = vadd.f32 %v1490_v35, %v1488_v52 }
 0xb19   : > { %v1492_v24 = vadd.f32 %v1491_v57, %v1489_v3 }
 0xb1b   : > { %v1493_v58 = vrot.slane %v1492_v24, 4 }
 0xb1d   : > { %v1494_v4 = vadd.f32 %v1493_v58, %v1492_v24 }
 0xb1f   : > { %v1495_v32 = vrot.slane %v1494_v4, 2 }
 0xb21   : > { %v1496_v41 = vadd.f32 %v1495_v32, %v1494_v4 }
 0xb23   : > { %v1497_v51 = vrot.slane %v1496_v41, 1 }
 0xb25   : > { %v1498_v43 = vadd.f32 %v1497_v51, %v1496_v41 }
 0xb27   : > { %v1499_v59 = vmul.f32 %v1498_v43, %v1498_v43 }
 0xb29   : > { %2671 = vmatmul.mubr.f32.vlgmr.msra.gmra.mxu1 %v1499_v59 }
 0xb2a   : > { %2717 = vmatpush3.msk.msra.mxu1 %vm4291_vm13, %v4240_v17 }
 0xb2b   : > { %2724 = vmatprep.subr.mxu1 %v4241_v62 }
 0xbe9   : > { %v1566_v8 = vpop.f32.mrf.mxu1 }
 0xbea   : > { %v1570_v9 = vadd.f32 1.0, %v1566_v8  ;;  %v1573_v14 = vadd.f32 1e-12, %v1566_v8 }
 0xbeb   : > { %v2672_v44 = vpop.f32.mrf.mxu1 }
 0xbec   : > { %2910 = vrcp.f32 %v1570_v9 }
 0xbed   : > { %2912 = vrsqrt.f32 %v1573_v14 }
 0xbf9   : > { %v2911_v12 = vpop.eup %2910 }
 0xbfa   : > { %v1572_v45 = vmul.f32 %v2911_v12, %v1566_v8  ;;  %v2913_v61 = vpop.eup %2912 }
 0xbfc   : > { %v1575_v56 = vmul.f32 %v2913_v61, %v1572_v45 }
 0xbfe   : > { %2676 = vmatmul.mubr.msk.f32.vlgmr.msra.gmra.mxu0 %vm4292_vm3, %v1575_v56  ;;  %vm4293_vm3 = vnez %v4232_v36 }
 0xbff   : > { %2679 = vmatpush3.msk.msra.mxu0 %vm3235_vm8, %v4240_v17 }
 0xc00   : > { %2680 = vmatprep.subr.msk.mxu0 %vm3243_vm9, %v4240_v17 }
 0xc01   : > { %2681 = vmatpush3.msk.msra.mxu0 %vm3243_vm9, %v4240_v17 }
 0xc02   : > { %2682 = vmatprep.subr.msk.mxu0 %vm3272_vm12, %v4240_v17 }
 0xc03   : > { %2683 = vmatpush3.msk.msra.mxu0 %vm3272_vm12, %v4240_v17 }
 0xc04   : > { %2684 = vmatprep.subr.msk.mxu0 %vm3283_vm15, %v4240_v17 }
 0xc05   : > { %2685 = vmatpush3.msk.msra.mxu0 %vm3283_vm15, %v4240_v17 }
 0xc06   : > { %2686 = vmatprep.subr.msk.mxu0 %vm3294_vm4, %v4240_v17 }
 0xc07   : > { %2687 = vmatpush3.msk.msra.mxu0 %vm3294_vm4, %v4240_v17 }
 0xc08   : > { %2688 = vmatprep.subr.msk.mxu0 %vm3307_vm7, %v4240_v17 }
 0xc09   : > { %2689 = vmatpush3.msk.msra.mxu0 %vm3307_vm7, %v4240_v17 }
 0xc0a   : > { %2690 = vmatprep.subr.msk.mxu0 %vm4242_vm10, %v4240_v17 }
 0xc0b   : > { %2691 = vmatpush3.msk.msra.mxu0 %vm4242_vm10, %v4240_v17 }
 0xc0c   : > { %2692 = vmatprep.subr.msk.mxu0 %vm4243_vm1, %v4240_v17 }
 0xc0d   : > { %2693 = vmatpush3.msk.msra.mxu0 %vm4243_vm1, %v4240_v17 }
 0xc0e   : > { %2694 = vmatprep.subr.msk.mxu0 %vm4244_vm14, %v4240_v17 }
 0xc0f   : > { %2695 = vmatpush3.msk.msra.mxu0 %vm4244_vm14, %v4240_v17 }
 0xc10   : > { %2696 = vmatprep.subr.msk.mxu0 %vm4245_vm5, %v4240_v17 }
 0xc11   : > { %2697 = vmatpush3.msk.msra.mxu0 %vm4245_vm5, %v4240_v17 }
 0xc12   : > { %2698 = vmatprep.subr.msk.mxu0 %vm4286_vm0, %v4240_v17 }
 0xc13   : > { %2699 = vmatpush3.msk.msra.mxu0 %vm4286_vm0, %v4240_v17 }
 0xc14   : > { %2700 = vmatprep.subr.msk.mxu0 %vm4287_vm2, %v4240_v17 }
 0xc15   : > { %2701 = vmatpush3.msk.msra.mxu0 %vm4287_vm2, %v4240_v17  ;;  %vm4294_vm2 = vnez %v4248_v63 }
 0xc16   : > { %2702 = vmatprep.subr.msk.mxu0 %vm4293_vm3, %v4240_v17 }
 0xc17   : > { %2703 = vmatpush3.msk.msra.mxu0 %vm4293_vm3, %v4240_v17 }
 0xc18   : > { %2704 = vmatprep.subr.msk.mxu0 %vm4288_vm6, %v4240_v17 }
 0xc19   : > { %2705 = vmatpush3.msk.msra.mxu0 %vm4288_vm6, %v4240_v17 }
 0xc1a   : > { %2706 = vmatprep.subr.msk.mxu0 %vm4289_vm11, %v4240_v17 }
 0xc1b   : > { %2707 = vmatpush3.msk.msra.mxu0 %vm4289_vm11, %v4240_v17  ;;  %vm4296_vm11 = vcmask 64512  }
 0xc1c   : > { %2708 = vmatprep.subr.msk.mxu0 %vm4294_vm2, %v4240_v17  ;;  %vm4297_vm6 = vmmov %vm4296_vm11 }
 0xc1d   : > { %2709 = vmatpush3.msk.msra.mxu0 %vm4294_vm2, %v4240_v17  ;;  %vm4295_vm2 = vmmov 0   ;;  %vm4299_vm3 = vmmov %vm4297_vm6 }
 0xc1e   : > { %2759 = vmatprep.subr.mxu0 %v4241_v62 }
 0xcbe   : > { %v1645_v19 = vpop.f32.mrf.mxu0 }
 0xcbf   : > { %v1649_v21 = vmul.f32 %v1645_v19, %v1498_v43 }
 0xcc0   : > { %v2677_v16 = vpop.f32.mrf.mxu0 }
 0xcc1   : > { %v1653_v10 = vrot.slane %v1649_v21, %v3631_v7 }
 0xcc3   : > { %v1654_v47 = vmul.f32 %v1653_v10, %v3449_v39  ;;  %v1655_v23 = vmul.f32 %v1653_v10, %v3451_v46  ;;  %v1656_v28 = vmul.f32 %v1653_v10, %v3454_v31  ;;  %v1657_v5 = vmul.f32 %v1653_v10, %v3457_v2 }
 0xcc5   : > { %2710 = vmatprep.mubr.f32.mxu0 %v1654_v47 }
 0xcc6   : > { %2711 = vmatmul.mubr.f32.vlgmr.msra.gmra.mxu0 %v1655_v23 }
 0xcc7   : > { %2713 = vmatprep.mubr.f32.mxu0 %v1656_v28  ;;  %2760 = vmatpush3.msk.msra.mxu0 %vm4291_vm13, %v4240_v17  ;;  %vm4298_vm13 = vmmov %vm4297_vm6 }
 0xcca   : > { %2714 = vmatmul.mubr.f32.gmra.mxu0 %v1657_v5 }
 0xccb   : > { %2761 = vmatprep.mubr.msk.f32.mxu0 %vm4295_vm2, %v4241_v62 }
 0xd86   : > { %v2712_v7 = vpop.f32.mrf.mxu0 }
 0xd87   : > { %v1744_v37 = vadd.f32 %v2712_v7, %v3800_v1 }
 0xd88   : > { %v1724_v30 = vpop.f32.mrf.mxu0 }
 0xd89   : > { %v1743_v49 = vadd.f32 %v1724_v30, %v3803_v48  ;;  %v1750_v60 = vsel %vm4296_vm11, %v1744_v37, -inf  ;;  %vm4301_vm11 = vmmov %vm4299_vm3 }
 0xd8a   : > { %1751 = vmax.xlane.f32.xlu1 %v1750_v60  ;;  %v2715_v53 = vpop.f32.mrf.mxu0 }
 0xd8b   : > { %v1746_v34 = vadd.f32 %v2715_v53, %v3808_v42  ;;  %v1747_v6 = vsel %vm4297_vm6, %v1743_v49, -inf  ;;  %vm4300_vm6 = vmmov %vm4299_vm3 }
 0xd8c   : > { %1748 = vmax.xlane.f32.xlu0 %v1747_v6  ;;  %v1734_v50 = vpop.f32.mrf.mxu0 }
 0xd8d   : > { %v1745_v0 = vadd.f32 %v1734_v50, %v3813_v26  ;;  %v1756_v35 = vsel %vm4298_vm13, %v1746_v34, -inf  ;;  %vm4302_vm13 = vmmov %vm4299_vm3 }
 0xd8e   : > { %1757 = vmax.xlane.f32.xlu1 %v1756_v35 }
 0xd8f   : > { %v1753_v1 = vsel %vm4299_vm3, %v1745_v0, -inf }
 0xd90   : > { %1754 = vmax.xlane.f32.xlu0 %v1753_v1 }
 0xe13   : > { %v1752_v52 = vpop.xlane.xlu1 %1751 }
 0xe14   : > { %v1760_v48 = vsub.f32 %v1744_v37, %v1752_v52 }
 0xe15   : > { %v1749_v3 = vpop.xlane.xlu0 %1748 }
 0xe16   : > { %v1765_v57 = vmul.f32 1.442695, %v1760_v48  ;;  %v1759_v24 = vsub.f32 %v1743_v49, %v1749_v3 }
 0xe17   : > { %v1758_v58 = vpop.xlane.xlu1 %1757 }
 0xe18   : > { %2914 = vpow2.f32 %v1765_v57  ;;  %v1763_v42 = vmul.f32 1.442695, %v1759_v24  ;;  %v1762_v4 = vsub.f32 %v1746_v34, %v1758_v58 }
 0xe19   : > { %v1755_v32 = vpop.xlane.xlu0 %1754 }
 0xe1a   : > { %2916 = vpow2.f32 %v1763_v42  ;;  %v1769_v41 = vmul.f32 1.442695, %v1762_v4  ;;  %v1761_v51 = vsub.f32 %v1745_v0, %v1755_v32 }
 0xe1c   : > { %2918 = vpow2.f32 %v1769_v41  ;;  %v1767_v26 = vmul.f32 1.442695, %v1761_v51 }
 0xe1e   : > { %2920 = vpow2.f32 %v1767_v26 }
 0xe25   : > { %v2915_v43 = vpop.eup %2914 }
 0xe26   : > { %v1774_v59 = vsel %vm4300_vm6, %v2915_v43, 0.0  ;;  %vm4303_vm6 = vmmov %vm4299_vm3 }
 0xe27   : > { %v2917_v8 = vpop.eup %2916  ;;  %1775 = vadd.xlane.f32.xlu1 %v1774_v59 }
 0xe28   : > { %v1771_v9 = vsel %vm4301_vm11, %v2917_v8, 0.0  ;;  %vm4304_vm11 = vmmov %vm4299_vm3 }
 0xe29   : > { %v2919_v14 = vpop.eup %2918  ;;  %1772 = vadd.xlane.f32.xlu0 %v1771_v9 }
 0xe2a   : > { %v1780_v44 = vsel %vm4299_vm3, %v2919_v14, 0.0 }
 0xe2b   : > { %v2921_v12 = vpop.eup %2920  ;;  %1781 = vadd.xlane.f32.xlu1 %v1780_v44 }
 0xe2c   : > { %v1777_v45 = vsel %vm4302_vm13, %v2921_v12, 0.0  ;;  %vm4305_vm13 = vmmov %vm4299_vm3 }
 0xe2d   : > { %1778 = vadd.xlane.f32.xlu0 %v1777_v45 }
 0xeb0   : > { %v1776_v61 = vpop.xlane.xlu1 %1775 }
 0xeb1   : > { %2922 = vrcp.f32 %v1776_v61 }
 0xeb2   : > { %v1773_v56 = vpop.xlane.xlu0 %1772 }
 0xeb3   : > { %2924 = vrcp.f32 %v1773_v56 }
 0xeb4   : > { %v1782_v19 = vpop.xlane.xlu1 %1781 }
 0xeb5   : > { %2926 = vrcp.f32 %v1782_v19 }
 0xeb6   : > { %v1779_v21 = vpop.xlane.xlu0 %1778 }
 0xeb7   : > { %2928 = vrcp.f32 %v1779_v21 }
 0xebe   : > { %v2923_v16 = vpop.eup %2922 }
 0xebf   : > { %v1788_v23 = vmul.f32 %v2923_v16, %v2915_v43 }
 0xec0   : > { %v2925_v10 = vpop.eup %2924 }
 0xec1   : > { %v1787_v47 = vmul.f32 %v2925_v10, %v2917_v8 }
 0xec2   : > { %v2927_v28 = vpop.eup %2926 }
 0xec3   : > { %2718 = vmatprep.mubr.msk.f32.mxu1 %vm4303_vm6, %v1787_v47  ;;  %v1790_v37 = vmul.f32 %v2927_v28, %v2919_v14 }
 0xec4   : > { %v2929_v5 = vpop.eup %2928  ;;  %2719 = vmatmul.mubr.msk.f32.vlgmr.msra.gmra.mxu1 %vm4304_vm11, %v1788_v23 }
 0xec5   : > { %v1789_v7 = vmul.f32 %v2929_v5, %v2921_v12  ;;  %2725 = vmatpush3.msk.msra.mxu1 %vm3235_vm8, %v4240_v17  ;;  %vm4306_vm8 = vnez %v4230_v33 }
 0xec6   : > { %2726 = vmatprep.subr.mxu1 %v4241_v62 }
 0xec7   : > { %2721 = vmatprep.mubr.msk.f32.mxu1 %vm4299_vm3, %v1789_v7  ;;  %2727 = vmatpush3.msk.msra.mxu1 %vm3243_vm9, %v4240_v17  ;;  %vm4307_vm9 = vnez %v4232_v36 }
 0xec8   : > { %2722 = vmatmul.mubr.msk.f32.gmra.mxu1 %vm4305_vm13, %v1790_v37  ;;  %2728 = vmatprep.subr.mxu1 %v4241_v62 }
 0xec9   : > { %2729 = vmatpush3.msk.msra.mxu1 %vm3272_vm12, %v4240_v17  ;;  %2756 = vmatprep.mubr.msk.f32.mxu1 %vm4295_vm2, %v4241_v62  ;;  %vm4308_vm12 = vnez %v4234_v38 }
 0xeca   : > { %2730 = vmatprep.subr.mxu1 %v4241_v62 }
 0xecb   : > { %2731 = vmatpush3.msk.msra.mxu1 %vm3283_vm15, %v4240_v17  ;;  %vm4309_vm15 = vnez %v4236_v40 }
 0xecc   : > { %2732 = vmatprep.subr.mxu1 %v4241_v62 }
 0xecd   : > { %2733 = vmatpush3.msk.msra.mxu1 %vm3294_vm4, %v4240_v17  ;;  %vm4310_vm4 = vnez %v4248_v63 }
 0xece   : > { %2734 = vmatprep.subr.mxu1 %v4241_v62 }
 0xecf   : > { %2735 = vmatpush3.msk.msra.mxu1 %vm3307_vm7, %v4240_v17  ;;  %vm4311_vm7 = vmmov %vm4299_vm3 }
 0xed0   : > { %2736 = vmatprep.subr.mxu1 %v4241_v62 }
 0xed1   : > { %2737 = vmatpush3.msk.msra.mxu1 %vm4242_vm10, %v4240_v17 }
 0xed2   : > { %2738 = vmatprep.subr.mxu1 %v4241_v62 }
 0xed3   : > { %2739 = vmatpush3.msk.msra.mxu1 %vm4243_vm1, %v4240_v17 }
 0xed4   : > { %2740 = vmatprep.subr.mxu1 %v4241_v62 }
 0xed5   : > { %2741 = vmatpush3.msk.msra.mxu1 %vm4244_vm14, %v4240_v17 }
 0xed6   : > { %2742 = vmatprep.subr.mxu1 %v4241_v62 }
 0xed7   : > { %2743 = vmatpush3.msk.msra.mxu1 %vm4245_vm5, %v4240_v17 }
 0xed8   : > { %2744 = vmatprep.subr.mxu1 %v4241_v62 }
 0xed9   : > { %2745 = vmatpush3.msk.msra.mxu1 %vm4286_vm0, %v4240_v17 }
 0xeda   : > { %2746 = vmatprep.subr.mxu1 %v4241_v62 }
 0xedb   : > { %2747 = vmatpush3.msk.msra.mxu1 %vm4306_vm8, %v4240_v17 }
 0xedc   : > { %2748 = vmatprep.subr.mxu1 %v4241_v62 }
 0xedd   : > { %2749 = vmatpush3.msk.msra.mxu1 %vm4307_vm9, %v4240_v17 }
 0xede   : > { %2750 = vmatprep.subr.mxu1 %v4241_v62 }
 0xedf   : > { %2751 = vmatpush3.msk.msra.mxu1 %vm4308_vm12, %v4240_v17 }
 0xee0   : > { %2752 = vmatprep.subr.mxu1 %v4241_v62 }
 0xee1   : > { %2753 = vmatpush3.msk.msra.mxu1 %vm4309_vm15, %v4240_v17 }
 0xee2   : > { %2754 = vmatprep.subr.mxu1 %v4241_v62 }
 0xee3   : > { %2755 = vmatpush3.msk.msra.mxu1 %vm4310_vm4, %v4240_v17 }
 0xf84   : > { %v2720_v54 = vpop.f32.mrf.mxu1 }
 0xf85   : > { %v1889_v15 = vmul.f32 %v2720_v54, %v3451_v46 }
 0xf86   : > { %v1869_v55 = vpop.f32.mrf.mxu1 }
 0xf87   : > { %v1888_v11 = vmul.f32 %v1869_v55, %v3449_v39 }
 0xf88   : > { %v2723_v13 = vpop.f32.mrf.mxu1 }
 0xf89   : > { %v1892_v20 = vadd.f32 %v1889_v15, %v1888_v11  ;;  %v1891_v25 = vmul.f32 %v2723_v13, %v3457_v2 }
 0xf8a   : > { %v1879_v18 = vpop.f32.mrf.mxu1 }
 0xf8b   : > { %v1890_v22 = vmul.f32 %v1879_v18, %v3454_v31 }
 0xf8d   : > { %v1893_v27 = vadd.f32 %v1892_v20, %v1890_v22 }
 0xf8f   : > { %v1894_v29 = vadd.f32 %v1893_v27, %v1891_v25 }
 0xf91   : > { %v1895_v33 = vrot.slane %v1894_v29, 4 }
 0xf93   : > { %v1896_v36 = vadd.f32 %v1895_v33, %v1894_v29 }
 0xf95   : > { %v1897_v38 = vrot.slane %v1896_v36, 2 }
 0xf97   : > { %v1898_v40 = vadd.f32 %v1897_v38, %v1896_v36 }
 0xf99   : > { %v1899_v17 = vrot.slane %v1898_v40, 1 }
 0xf9b   : > { %v1900_v62 = vadd.f32 %v1899_v17, %v1898_v40 }
 0xf9d   : > { %v1901_v39 = vmul.f32 %v1900_v62, %v1900_v62 }
 0xf9f   : > { %2757 = vmatmul.mubr.f32.vlgmr.msra.gmra.mxu1 %v1901_v39 }
0x105f   : > { %v1968_v63 = vpop.f32.mrf.mxu1 }
0x1060   : > { %v1972_v46 = vadd.f32 1.0, %v1968_v63  ;;  %v1975_v30 = vadd.f32 1e-12, %v1968_v63 }
0x1061   : > { %v2758_v49 = vpop.f32.mrf.mxu1 }
0x1062   : > { %2930 = vrcp.f32 %v1972_v46 }
0x1063   : > { %2932 = vrsqrt.f32 %v1975_v30 }
0x106f   : > { %v2931_v31 = vpop.eup %2930 }
0x1070   : > { %v1974_v2 = vmul.f32 %v2931_v31, %v1968_v63  ;;  %v2933_v60 = vpop.eup %2932 }
0x1072   : > { %v1977_v53 = vmul.f32 %v2933_v60, %v1974_v2 }
0x1074   : > { %2762 = vmatmul.mubr.msk.f32.vlgmr.msra.gmra.mxu0 %vm4311_vm7, %v1977_v53 }
0x1134   : > { %v2047_v34 = vpop.f32.mrf.mxu0 }
0x1135   : > { %v2051_v6 = vmul.f32 %v2047_v34, %v1900_v62 }
0x1136   : > { %v2763_v50 = vpop.f32.mrf.mxu0 }
0x1137   : > { %2052 = vst [vmem:[%s177_s29] sm:$0x1] %v2051_v6 }
0x1138   : > { %2973 = shalt.err (!%p2970_p0)
}
0x1139   : > { %s2974_s11 = scalar_lea.hbm %s4103_s6, 16  ;;  %s2978_s20 = scalar_lea.hbm %s4141_s3, 32 }
0x113a   : > { %p2975_p1 = scmp.ne.s32.totalorder %s4103_s6, %s2974_s11  ;;  %p2979_p4 = scmp.lt.s32.totalorder %s4103_s6, %s4141_s3 }
0x113b   : > { %p2980_p7 = scmp.lt.s32.totalorder %s2978_s20, %s2974_s11 }
0x113c   : > { %p2976_p2 = pnand %p2975_p1, %p3099_p5 }
0x113d   : > { %p2981_p6 = por %p2980_p7, %p2979_p4 }
0x113e   : > { %p2977_p3 = pneg %p2976_p2 }
0x1140   : > { %p2982_p8 = pnand %p2981_p6, %p2977_p3 }
0x1142   : > { %2985 = shalt.err (!%p2982_p8)
}
0x1143   : > { %2768 = dma.vmem_to_hbm [thread:$0]  (%p3099_p5), %s2067_s30, 16, %s4103_s6, %s2054_s7  }
0x1144 PF: > { %p2780_p9 = scmp.ge.s32.totalorder %s3024_s15, 2  ;;  %s2078_s26 = sand.u32 1, %s3012_s12  }
0x1145   : > { %p4312_p10 = scmp.ne.s32.totalorder %s4197_s23, 0  ;;  %s2079_s27 = scalar_lea.sflag [#allocation5], %s2078_s26 }
0x1147   : > { %p2775_p11 = pnand %p2780_p9, %p4312_p10 }
0x1149   : > { %p2776_p12 = pneg %p2775_p11 }
0x114b   : > { %3007 = dma.done.wait (%p2776_p12), %s2079_s27, 16  }
0x114c   : > { %3009 = vsyncadd (%p2776_p12), %s2079_s27, 4294967280  ;;  %p14_p13 = scmp.ge.s32.totalorder %s3086_s18, 4   ;;  %s4313_s12 = smov %s3016_s13 }
0x114d   : > { %s4314_s13 = smov %s3020_s14  ;;  %s4315_s14 = smov %s3097_s21 }
0x114e   : > { %s4316_s15 = smov %s3086_s18  ;;  %16 = sbr.rel (!%p14_p13) target bundleno = 4 (0x4), region = 79 }
0x1153   :  { %2083 = vsyncpa [#allocation4], 1 }
0x1154   :  { %2085 = vsyncpa [#allocation4 + $0x1], 1 }
0x1155   :  { %2086 = vsyncpa [#allocation5], 1 }
0x1156   :  { %2088 = vsyncpa [#allocation5 + $0x1], 1 }

</bundles_post_ra>
